<compile_context>
chip_gen: v6e
topology: v6e:2x2x1
jax: 0.10.0
libtpu: 0.0.40
codegen_flags: <defaults>
</compile_context>

<pallas_src>
import jax
import jax.numpy as jnp
from jax import lax
from jax.experimental import pallas as pl
from jax.experimental.pallas import tpu as pltpu

EMBED = 768                  # fixed by Conv2d kernel width (K, 768)
NUM_FILTERS = 64             # fixed by Conv2d out_channels
NUM_TAPS = 6                 # 1 + 2 + 3 conv weight taps -> matmul N = 384
CAT_DIM = 3 * NUM_FILTERS    # 192, fixed by nn.Linear(192, hidden_size)
LANE = 128                   # keep kernel-visible last dims lane-dense


def _round_up(x, m):
    return ((x + m - 1) // m) * m


def _vmem_caps():
    """(Bt-sizing budget, vmem_limit_bytes) derived from physical VMEM.

    v5e/v6e: 128 MiB physical -> ~100 MiB limit / ~60 MiB working-set budget.
    v7x:      64 MiB physical -> ~48 MiB limit / ~29 MiB budget per TC.
    """
    cap = 128 << 20
    try:
        cap = int(getattr(pltpu.get_tpu_info(), "vmem_capacity_bytes", cap))
    except Exception:
        pass
    limit = max(32 << 20, min(cap - (16 << 20), 100 << 20))
    budget = (limit * 3) // 5
    return budget, limit


def _pick_batch_tile(B, L, Hp, budget):
    # Rough per-example VMEM: double-buffered f32 input block + bf16 copy +
    # f32 matmul result / rolled / per-K temporaries + pooled / out rows.
    per_ex = 6 * L * EMBED * 4 + 3 * Hp * 4
    bt = int(budget // per_ex)
    if bt >= B:
        # Whole batch fits in one tile: still split into 2 parallel grid steps
        # (v7x has 2 TensorCores) when the (Bt, Hp) out block stays 8-aligned.
        return (B // 2) if (B >= 16 and B % 16 == 0) else B
    bt = max(8, (bt // 8) * 8)                   # sublane-aligned out block
    return min(bt, B)                            # ragged last block handled by Pallas


# ---------------------------------------------------------------------------
# Kernel 1: conv head (one wide matmul + minimal rolls + static-slice maxpool)
#           + fused Linear(192 -> H)
# ---------------------------------------------------------------------------
def _conv_linear_kernel(x_ref, wcat_ref, bcat_ref, wl_ref, bl_ref, out_ref):
    Bt, L, E = x_ref.shape
    N = Bt * L
    F = NUM_FILTERS

    # Stream f32 from HBM (single pass) and cast to bf16 on the VPU right
    # before the MXU matmul (no wrapper-level convert round trip).
    x2d = x_ref[...].reshape(N, E).astype(jnp.bfloat16)

    # One wide matmul over all 6 conv taps: (Bt*L, 768) @ (768, 384), f32 acc.
    # Column layout (grouped by required row shift):
    #   [  0:128) shift-1 taps : K2.t1 | K3.t1   (one aligned lane tile)
    #   [128:192) shift-2 tap  : K3.t2
    #   [192:384) shift-0 taps : K1.t0 | K2.t0 | K3.t0
    a = jnp.dot(x2d, wcat_ref[...], preferred_element_type=jnp.float32)   # (N, 384)

    # Row-shifted taps via XLU sublane roll, applied ONLY to the 192 lanes that
    # need shifting.  r1[i] == tap(row i+1), r2[i] == tap(row i+2).
    r1 = pltpu.roll(a[:, 0:2 * F], shift=N - 1, axis=0)                   # (N, 128)
    r2 = pltpu.roll(a[:, 2 * F:3 * F], shift=N - 2, axis=0)               # (N,  64)

    # Per-K conv responses (pre-bias).  Rows whose shifted taps wrapped across
    # an example boundary are excluded from the pool slices below, so no
    # masking is needed.
    c1 = a[:, 3 * F:4 * F].reshape(Bt, L, F)
    c2 = (a[:, 4 * F:5 * F] + r1[:, 0:F]).reshape(Bt, L, F)
    c3 = (a[:, 5 * F:6 * F] + r1[:, F:2 * F] + r2).reshape(Bt, L, F)

    # Max over the valid conv positions (static slices).  ReLU and the
    # per-position-constant bias commute with the max, so both are applied
    # once on the pooled (Bt, 192) block.
    p1 = jnp.max(c1, axis=1)                      # K=1: all L positions valid
    p2 = jnp.max(c2[:, :L - 1, :], axis=1)        # K=2: positions 0 .. L-2
    p3 = jnp.max(c3[:, :L - 2, :], axis=1)        # K=3: positions 0 .. L-3
    pooled = jnp.maximum(
        jnp.concatenate([p1, p2, p3], axis=-1) + bcat_ref[...], 0.0)      # (Bt, 192)

    # Fused Linear(192 -> H); dropout is identity at inference.
    out_ref[...] = (jnp.dot(pooled, wl_ref[...], preferred_element_type=jnp.float32)
                    + bl_ref[...])


def conv_linear(features, wcat, bcat, wl, bl, *, vmem_budget, vmem_limit):
    B, L, E = features.shape
    if L < 3:
        raise ValueError("need at least 3 code lines (L >= 3) for the K=3 conv")
    Hp = wl.shape[1]
    Bt = _pick_batch_tile(B, L, Hp, vmem_budget)
    nb = pl.cdiv(B, Bt)

    return pl.pallas_call(
        _conv_linear_kernel,
        out_shape=jax.ShapeDtypeStruct((B, Hp), jnp.float32),
        grid=(nb,),
        in_specs=[
            pl.BlockSpec((Bt, L, E), lambda i: (i, 0, 0)),
            pl.BlockSpec((E, NUM_TAPS * NUM_FILTERS), lambda i: (0, 0)),
            pl.BlockSpec((1, CAT_DIM), lambda i: (0, 0)),
            pl.BlockSpec((CAT_DIM, Hp), lambda i: (0, 0)),
            pl.BlockSpec((1, Hp), lambda i: (0, 0)),
        ],
        out_specs=pl.BlockSpec((Bt, Hp), lambda i: (i, 0)),
        compiler_params=pltpu.CompilerParams(
            dimension_semantics=("parallel",),          # megacore batch split
            vmem_limit_bytes=int(vmem_limit)),
    )(features, wcat, bcat, wl, bl)


# ---------------------------------------------------------------------------
# Kernel 2: 3-layer Elman RNN (tanh), wavefront recurrence, fused out_proj_new
# ---------------------------------------------------------------------------
def _rnn_head_kernel(y_ref, xl_ref,
                     wih0_ref, whh0_ref, b0_ref,
                     wih1_ref, whh1_ref, b1_ref,
                     wih2_ref, whh2_ref, b2_ref,
                     wox_ref, woy_ref, bo_ref,
                     out_ref, xp_scr, ys_scr):
    B = y_ref.shape[0]
    Hp = whh0_ref.shape[0]
    f32, bf16 = jnp.float32, jnp.bfloat16

    # Loop-invariant loads hoisted out of the recurrence (no per-iteration
    # re-issue of the same VMEM->vreg loads).
    whh0 = whh0_ref[...]
    wih1 = wih1_ref[...]
    whh1 = whh1_ref[...]
    wih2 = wih2_ref[...]
    whh2 = whh2_ref[...]
    b1 = b1_ref[...]
    b2 = b2_ref[...]

    # Layer-0 input projection hoisted out of the recurrence as one batched
    # matmul.  Kept f32: raw manual features can have wide dynamic range and
    # this matmul runs only once, outside the serial loop.
    xp_scr[...] = (jnp.dot(y_ref[...], wih0_ref[...], preferred_element_type=f32)
                   + b0_ref[...])

    # Wavefront over the 3 layers: at step t compute layer0(t), layer1(t-1),
    # layer2(t-2).  All three updates depend only on the carries from step t-1,
    # so their MXU weight streams and EUP tanh can overlap instead of forming a
    # serial chain of 5 dependent dot+tanh per step.
    def step(t, carry):
        h0, h1, h2 = carry                       # h0[t-1], h1[t-2], h2[t-3]
        i0 = jnp.minimum(t, B - 1)               # clamp: rows >= B never feed a valid output
        n0 = jnp.tanh(xp_scr[pl.ds(i0, 1), :]
                      + jnp.dot(h0.astype(bf16), whh0, preferred_element_type=f32))
        n1 = jnp.tanh(jnp.dot(h0.astype(bf16), wih1, preferred_element_type=f32)
                      + jnp.dot(h1.astype(bf16), whh1, preferred_element_type=f32)
                      + b1)
        n2 = jnp.tanh(jnp.dot(h1.astype(bf16), wih2, preferred_element_type=f32)
                      + jnp.dot(h2.astype(bf16), whh2, preferred_element_type=f32)
                      + b2)
        # Keep prologue hidden states at their zero initial value.
        n1 = jnp.where(t >= 1, n1, 0.0)
        n2 = jnp.where(t >= 2, n2, 0.0)
        ys_scr[pl.ds(jnp.maximum(t - 2, 0), 1), :] = n2
        return (n0, n1, n2)

    h_init = jnp.zeros((1, Hp), f32)
    steps = B + 2
    lax.fori_loop(0, steps, step, (h_init, h_init, h_init),
                  unroll=steps if steps <= 40 else 8)

    # y = tanh(rnn hidden states); fused out_proj_new on the split weight:
    # out = [xl | y] @ W_o + b_o == sum(xl*wo_x + y*wo_y, -1) + b_o.
    y = jnp.tanh(ys_scr[...])
    out_ref[...] = (jnp.sum(xl_ref[...] * wox_ref[...] + y * woy_ref[...],
                            axis=-1, keepdims=True) + bo_ref[...])


def rnn_head(manual, xl, w, *, vmem_limit):
    B, Hp = xl.shape
    return pl.pallas_call(
        _rnn_head_kernel,
        out_shape=jax.ShapeDtypeStruct((B, 1), jnp.float32),
        scratch_shapes=[pltpu.VMEM((B, Hp), jnp.float32),   # hoisted input projection
                        pltpu.VMEM((B, Hp), jnp.float32)],  # per-step h2 outputs
        compiler_params=pltpu.CompilerParams(vmem_limit_bytes=int(vmem_limit)),
    )(manual, xl,
      w["wih0"], w["whh0"], w["b0"],
      w["wih1"], w["whh1"], w["b1"],
      w["wih2"], w["whh2"], w["b2"],
      w["wox"], w["woy"], w["bo"])


# ---------------------------------------------------------------------------
# Full forward
# ---------------------------------------------------------------------------
@jax.jit
def roberta_classification_head(features, manual_features, p):
    H = p["wl"].shape[1]
    F = p["wih0"].shape[0]
    Hp = _round_up(H, LANE)
    Fp = _round_up(F, LANE)
    budget, limit = _vmem_caps()

    def pad2(x, r, c):                            # zero-pad a 2-D array to (r, c)
        return jnp.pad(x, ((0, r - x.shape[0]), (0, c - x.shape[1])))

    # Conv taps folded into one (768, 384) RHS, grouped by row shift:
    # [K2.t1 | K3.t1 | K3.t2 | K1.t0 | K2.t0 | K3.t0]; biases in [K1|K2|K3] order.
    wcat = jnp.concatenate(
        [p["wc2"][1], p["wc3"][1], p["wc3"][2],
         p["wc1"][0], p["wc2"][0], p["wc3"][0]], axis=-1).astype(jnp.bfloat16)
    bcat = jnp.concatenate([p["bc1"], p["bc2"], p["bc3"]], axis=-1)       # (1, 192)

    wl = pad2(p["wl"], CAT_DIM, Hp)
    bl = pad2(p["bl"], 1, Hp)

    xl = conv_linear(features, wcat, bcat, wl, bl,
                     vmem_budget=budget, vmem_limit=limit)                # (B, Hp)

    # RNN params: lane dims zero-padded to multiples of 128 (exact: padded
    # hidden lanes stay tanh(0) == 0); recurrent-path weights in bf16.
    bf = jnp.bfloat16
    rnn = dict(
        wih0=pad2(p["wih0"], Fp, Hp),             # used once outside the loop: keep f32
        whh0=pad2(p["whh0"], Hp, Hp).astype(bf),
        b0=pad2(p["b0"], 1, Hp),
        wih1=pad2(p["wih1"], Hp, Hp).astype(bf),
        whh1=pad2(p["whh1"], Hp, Hp).astype(bf),
        b1=pad2(p["b1"], 1, Hp),
        wih2=pad2(p["wih2"], Hp, Hp).astype(bf),
        whh2=pad2(p["whh2"], Hp, Hp).astype(bf),
        b2=pad2(p["b2"], 1, Hp),
        wox=pad2(p["wo"][:H].reshape(1, H), 1, Hp),
        woy=pad2(p["wo"][H:].reshape(1, H), 1, Hp),
        bo=p["bo"],
    )
    manual = pad2(manual_features.astype(jnp.float32),
                  manual_features.shape[0], Fp)
    # dropout == identity at inference
    return rnn_head(manual, xl, rnn, vmem_limit=limit)


# ---------------------------------------------------------------------------
# Deterministic parameter init (shapes match the torch module; stored pre-transposed)
# ---------------------------------------------------------------------------
def init_params(key, feature_size, hidden_size):
    keys = jax.random.split(key, 24)
    ki = iter(range(24))

    def u(shape, fan_in):
        bound = 1.0 / jnp.sqrt(jnp.float32(fan_in))
        return jax.random.uniform(keys[next(ki)], shape, jnp.float32, -bound, bound)

    H, F = hidden_size, feature_size
    p = {}
    # Conv2d(1, 64, (K, 768)) weight (64,1,K,768) stored as (K, 768, 64)
    for K in (1, 2, 3):
        fan = K * EMBED
        p[f"wc{K}"] = u((K, EMBED, NUM_FILTERS), fan)
        p[f"bc{K}"] = u((1, NUM_FILTERS), fan)
    # nn.RNN(feature_size, hidden_size, 3): weight_ih/hh stored transposed, biases pre-summed
    p["wih0"] = u((F, H), H)
    p["whh0"] = u((H, H), H)
    p["b0"] = u((1, H), H) + u((1, H), H)
    p["wih1"] = u((H, H), H)
    p["whh1"] = u((H, H), H)
    p["b1"] = u((1, H), H) + u((1, H), H)
    p["wih2"] = u((H, H), H)
    p["whh2"] = u((H, H), H)
    p["b2"] = u((1, H), H) + u((1, H), H)
    # nn.Linear(192, H) and nn.Linear(2H, 1), weights stored transposed
    p["wl"] = u((CAT_DIM, H), CAT_DIM)
    p["bl"] = u((1, H), CAT_DIM)
    p["wo"] = u((2 * H, 1), 2 * H)
    p["bo"] = u((1, 1), 2 * H)
    return p


# ---------------------------------------------------------------------------
# Pure-JAX reference (for sanity checking the kernels)
# ---------------------------------------------------------------------------
def reference(features, manual, p):
    B, L, E = features.shape
    outs = []
    for K in (1, 2, 3):
        w = p[f"wc{K}"]
        s = sum(jnp.einsum("ble,ec->blc", features[:, k: L - K + 1 + k, :], w[k])
                for k in range(K)) + p[f"bc{K}"]
        outs.append(jnp.max(jnp.maximum(s, 0.0), axis=1))
    x = jnp.concatenate(outs, axis=-1)                                   # (B, 192)

    H = p["wih0"].shape[1]

    def scan_fn(h, x_t):
        h0, h1, h2 = h
        h0 = jnp.tanh(x_t @ p["wih0"] + h0 @ p["whh0"] + p["b0"][0])
        h1 = jnp.tanh(h0 @ p["wih1"] + h1 @ p["whh1"] + p["b1"][0])
        h2 = jnp.tanh(h1 @ p["wih2"] + h2 @ p["whh2"] + p["b2"][0])
        return (h0, h1, h2), h2

    init = (jnp.zeros(H), jnp.zeros(H), jnp.zeros(H))
    _, ys = lax.scan(scan_fn, init, manual.astype(jnp.float32))
    y = jnp.tanh(ys)                                                     # (B, H)

    xl = x @ p["wl"] + p["bl"]
    cat = jnp.concatenate([xl, y], axis=-1)
    return cat @ p["wo"] + p["bo"]


if __name__ == "__main__":
    B, L = 4, 8                  # batch, number of code lines
    feature_size, hidden_size = 16, 32

    key = jax.random.PRNGKey(0)
    k1, k2, k3 = jax.random.split(key, 3)
    features = jax.random.normal(k1, (B, L, EMBED), jnp.float32)
    manual_features = jax.random.normal(k2, (B, feature_size), jnp.float32)
    params = init_params(k3, feature_size, hidden_size)

    out = roberta_classification_head(features, manual_features, params)
    out = jax.block_until_ready(out)

    ref = reference(features, manual_features, params)
    assert out.shape == (B, 1), out.shape
    # conv matmul + RNN recurrent path run in bf16 (f32 accumulation)
    assert jnp.allclose(out, ref, atol=3e-2, rtol=3e-2), (out, ref)

    print("KERNEL_OK")
</pallas_src>

<mosaic_0001>
module attributes {stable_mosaic.version = 11 : i64} {
  func.func @_conv_linear_kernel(%arg0: i32, %arg1: memref<4x8x768xf32, #tpu.memory_space<vmem>>, %arg2: memref<768x384xbf16, #tpu.memory_space<vmem>>, %arg3: memref<1x192xf32, #tpu.memory_space<vmem>>, %arg4: memref<192x128xf32, #tpu.memory_space<vmem>>, %arg5: memref<1x128xf32, #tpu.memory_space<vmem>>, %arg6: memref<4x128xf32, #tpu.memory_space<vmem>>) attributes {dimension_semantics = [#tpu.dimension_semantics<parallel>], iteration_bounds = array<i64: 1>, scalar_prefetch = 0 : i64, scratch_operands = 0 : i64, tpu.core_type = #tpu.core_type<tc>, window_params = [{transform_indices = @transform_0, window_bounds = array<i64: 4, 8, 768>}, {pipeline_mode = #tpu.pipeline_mode<synchronous>, transform_indices = @transform_1, window_bounds = array<i64: 768, 384>}, {pipeline_mode = #tpu.pipeline_mode<synchronous>, transform_indices = @transform_2, window_bounds = array<i64: 1, 192>}, {pipeline_mode = #tpu.pipeline_mode<synchronous>, transform_indices = @transform_3, window_bounds = array<i64: 192, 128>}, {pipeline_mode = #tpu.pipeline_mode<synchronous>, transform_indices = @transform_4, window_bounds = array<i64: 1, 128>}, {transform_indices = @transform_5, window_bounds = array<i64: 4, 128>}]} {
    %c0 = arith.constant 0 : index
    %c0_0 = arith.constant 0 : index
    %c0_1 = arith.constant 0 : index
    %0 = vector.load %arg1[%c0, %c0_0, %c0_1] : memref<4x8x768xf32, #tpu.memory_space<vmem>>, vector<4x8x768xf32>
    %1 = vector.shape_cast %0 : vector<4x8x768xf32> to vector<32x768xf32>
    %2 = arith.truncf %1 : vector<32x768xf32> to vector<32x768xbf16>
    %c0_2 = arith.constant 0 : index
    %c0_3 = arith.constant 0 : index
    %3 = vector.load %arg2[%c0_2, %c0_3] : memref<768x384xbf16, #tpu.memory_space<vmem>>, vector<768x384xbf16>
    %cst = arith.constant dense<0.000000e+00> : vector<32x384xf32>
    %4 = tpu.matmul %2, %3, %cst {dimension_numbers = #tpu.dot_dimension_numbers<[1], [0], [0], [1], [0, 0, 1, 1], [], []>} : vector<32x768xbf16>, vector<768x384xbf16>, vector<32x384xf32> -> vector<32x384xf32>
    %5 = vector.extract_strided_slice %4 {offsets = [0, 0], sizes = [32, 128], strides = [1, 1]} : vector<32x384xf32> to vector<32x128xf32>
    %c31_i32 = arith.constant 31 : i32
    %6 = tpu.dynamic_rotate %5 by %c31_i32 dim 0 : vector<32x128xf32>, i32 -> vector<32x128xf32>
    %7 = vector.extract_strided_slice %4 {offsets = [0, 128], sizes = [32, 64], strides = [1, 1]} : vector<32x384xf32> to vector<32x64xf32>
    %c30_i32 = arith.constant 30 : i32
    %8 = tpu.dynamic_rotate %7 by %c30_i32 dim 0 : vector<32x64xf32>, i32 -> vector<32x64xf32>
    %9 = vector.extract_strided_slice %4 {offsets = [0, 192], sizes = [32, 64], strides = [1, 1]} : vector<32x384xf32> to vector<32x64xf32>
    %10 = vector.shape_cast %9 : vector<32x64xf32> to vector<4x8x64xf32>
    %11 = vector.extract_strided_slice %4 {offsets = [0, 256], sizes = [32, 64], strides = [1, 1]} : vector<32x384xf32> to vector<32x64xf32>
    %12 = vector.extract_strided_slice %6 {offsets = [0, 0], sizes = [32, 64], strides = [1, 1]} : vector<32x128xf32> to vector<32x64xf32>
    %13 = arith.addf %11, %12 : vector<32x64xf32>
    %14 = vector.shape_cast %13 : vector<32x64xf32> to vector<4x8x64xf32>
    %15 = vector.extract_strided_slice %4 {offsets = [0, 320], sizes = [32, 64], strides = [1, 1]} : vector<32x384xf32> to vector<32x64xf32>
    %16 = vector.extract_strided_slice %6 {offsets = [0, 64], sizes = [32, 64], strides = [1, 1]} : vector<32x128xf32> to vector<32x64xf32>
    %17 = arith.addf %15, %16 : vector<32x64xf32>
    %18 = arith.addf %17, %8 : vector<32x64xf32>
    %19 = vector.shape_cast %18 : vector<32x64xf32> to vector<4x8x64xf32>
    %cst_4 = arith.constant dense<0xFF800000> : vector<4x64xf32>
    %20 = vector.multi_reduction <maximumf>, %10, %cst_4 [1] : vector<4x8x64xf32> to vector<4x64xf32>
    %21 = vector.extract_strided_slice %14 {offsets = [0, 0, 0], sizes = [4, 7, 64], strides = [1, 1, 1]} : vector<4x8x64xf32> to vector<4x7x64xf32>
    %cst_5 = arith.constant dense<0xFF800000> : vector<4x64xf32>
    %22 = vector.multi_reduction <maximumf>, %21, %cst_5 [1] : vector<4x7x64xf32> to vector<4x64xf32>
    %23 = vector.extract_strided_slice %19 {offsets = [0, 0, 0], sizes = [4, 6, 64], strides = [1, 1, 1]} : vector<4x8x64xf32> to vector<4x6x64xf32>
    %cst_6 = arith.constant dense<0xFF800000> : vector<4x64xf32>
    %24 = vector.multi_reduction <maximumf>, %23, %cst_6 [1] : vector<4x6x64xf32> to vector<4x64xf32>
    %25 = tpu.concatenate %20, %22, %24 in 1 : vector<4x64xf32>, vector<4x64xf32>, vector<4x64xf32> -> vector<4x192xf32>
    %c0_7 = arith.constant 0 : index
    %c0_8 = arith.constant 0 : index
    %26 = vector.load %arg3[%c0_7, %c0_8] : memref<1x192xf32, #tpu.memory_space<vmem>>, vector<1x192xf32>
    %27 = vector.broadcast %26 : vector<1x192xf32> to vector<4x192xf32>
    %28 = arith.addf %25, %27 : vector<4x192xf32>
    %cst_9 = arith.constant 0.000000e+00 : f32
    %29 = vector.broadcast %cst_9 : f32 to vector<4x192xf32>
    %30 = arith.maximumf %28, %29 : vector<4x192xf32>
    %c0_10 = arith.constant 0 : index
    %c0_11 = arith.constant 0 : index
    %31 = vector.load %arg4[%c0_10, %c0_11] : memref<192x128xf32, #tpu.memory_space<vmem>>, vector<192x128xf32>
    %cst_12 = arith.constant dense<0.000000e+00> : vector<4x128xf32>
    %32 = tpu.matmul %30, %31, %cst_12 {dimension_numbers = #tpu.dot_dimension_numbers<[1], [0], [0], [1], [0, 0, 1, 1], [], []>} : vector<4x192xf32>, vector<192x128xf32>, vector<4x128xf32> -> vector<4x128xf32>
    %c0_13 = arith.constant 0 : index
    %c0_14 = arith.constant 0 : index
    %33 = vector.load %arg5[%c0_13, %c0_14] : memref<1x128xf32, #tpu.memory_space<vmem>>, vector<1x128xf32>
    %34 = vector.broadcast %33 : vector<1x128xf32> to vector<4x128xf32>
    %35 = arith.addf %32, %34 : vector<4x128xf32>
    %c0_15 = arith.constant 0 : index
    %c0_16 = arith.constant 0 : index
    %36 = vector.load %arg6[%c0_15, %c0_16] : memref<4x128xf32, #tpu.memory_space<vmem>>, vector<4x128xf32>
    tpu.vector_store %arg6[%c0_15, %c0_16], %35 {strides = array<i32>} : memref<4x128xf32, #tpu.memory_space<vmem>>, vector<4x128xf32>,
    return
  }
  func.func @transform_0(%arg0: i32) -> (i32, i32, i32) {
    %c0_i32 = arith.constant 0 : i32
    %c0_i32_0 = arith.constant 0 : i32
    %c0_i32_1 = arith.constant 0 : i32
    return %arg0, %c0_i32, %c0_i32_0 : i32, i32, i32
  }
  func.func @transform_1(%arg0: i32) -> (i32, i32) {
    %c0_i32 = arith.constant 0 : i32
    %c0_i32_0 = arith.constant 0 : i32
    %c0_i32_1 = arith.constant 0 : i32
    return %c0_i32, %c0_i32_0 : i32, i32
  }
  func.func @transform_2(%arg0: i32) -> (i32, i32) {
    %c0_i32 = arith.constant 0 : i32
    %c0_i32_0 = arith.constant 0 : i32
    %c0_i32_1 = arith.constant 0 : i32
    return %c0_i32, %c0_i32_0 : i32, i32
  }
  func.func @transform_3(%arg0: i32) -> (i32, i32) {
    %c0_i32 = arith.constant 0 : i32
    %c0_i32_0 = arith.constant 0 : i32
    %c0_i32_1 = arith.constant 0 : i32
    return %c0_i32, %c0_i32_0 : i32, i32
  }
  func.func @transform_4(%arg0: i32) -> (i32, i32) {
    %c0_i32 = arith.constant 0 : i32
    %c0_i32_0 = arith.constant 0 : i32
    %c0_i32_1 = arith.constant 0 : i32
    return %c0_i32, %c0_i32_0 : i32, i32
  }
  func.func @transform_5(%arg0: i32) -> (i32, i32) {
    %c0_i32 = arith.constant 0 : i32
    %c0_i32_0 = arith.constant 0 : i32
    return %arg0, %c0_i32 : i32, i32
  }
}

module attributes {stable_mosaic.version = 11 : i64} {
  func.func @_rnn_head_kernel(%arg0: memref<4x128xf32, #tpu.memory_space<vmem>>, %arg1: memref<4x128xf32, #tpu.memory_space<vmem>>, %arg2: memref<128x128xf32, #tpu.memory_space<vmem>>, %arg3: memref<128x128xbf16, #tpu.memory_space<vmem>>, %arg4: memref<1x128xf32, #tpu.memory_space<vmem>>, %arg5: memref<128x128xbf16, #tpu.memory_space<vmem>>, %arg6: memref<128x128xbf16, #tpu.memory_space<vmem>>, %arg7: memref<1x128xf32, #tpu.memory_space<vmem>>, %arg8: memref<128x128xbf16, #tpu.memory_space<vmem>>, %arg9: memref<128x128xbf16, #tpu.memory_space<vmem>>, %arg10: memref<1x128xf32, #tpu.memory_space<vmem>>, %arg11: memref<1x128xf32, #tpu.memory_space<vmem>>, %arg12: memref<1x128xf32, #tpu.memory_space<vmem>>, %arg13: memref<1x1xf32, #tpu.memory_space<vmem>>, %arg14: memref<4x1xf32, #tpu.memory_space<vmem>>, %arg15: memref<4x128xf32, #tpu.memory_space<vmem>>, %arg16: memref<4x128xf32, #tpu.memory_space<vmem>>) attributes {dimension_semantics = [], scalar_prefetch = 0 : i64, scratch_operands = 2 : i64, tpu.core_type = #tpu.core_type<tc>} {
    %c0 = arith.constant 0 : index
    %c0_0 = arith.constant 0 : index
    %0 = vector.load %arg3[%c0, %c0_0] : memref<128x128xbf16, #tpu.memory_space<vmem>>, vector<128x128xbf16>
    %c0_1 = arith.constant 0 : index
    %c0_2 = arith.constant 0 : index
    %1 = vector.load %arg5[%c0_1, %c0_2] : memref<128x128xbf16, #tpu.memory_space<vmem>>, vector<128x128xbf16>
    %c0_3 = arith.constant 0 : index
    %c0_4 = arith.constant 0 : index
    %2 = vector.load %arg6[%c0_3, %c0_4] : memref<128x128xbf16, #tpu.memory_space<vmem>>, vector<128x128xbf16>
    %c0_5 = arith.constant 0 : index
    %c0_6 = arith.constant 0 : index
    %3 = vector.load %arg8[%c0_5, %c0_6] : memref<128x128xbf16, #tpu.memory_space<vmem>>, vector<128x128xbf16>
    %c0_7 = arith.constant 0 : index
    %c0_8 = arith.constant 0 : index
    %4 = vector.load %arg9[%c0_7, %c0_8] : memref<128x128xbf16, #tpu.memory_space<vmem>>, vector<128x128xbf16>
    %c0_9 = arith.constant 0 : index
    %c0_10 = arith.constant 0 : index
    %5 = vector.load %arg7[%c0_9, %c0_10] : memref<1x128xf32, #tpu.memory_space<vmem>>, vector<1x128xf32>
    %c0_11 = arith.constant 0 : index
    %c0_12 = arith.constant 0 : index
    %6 = vector.load %arg10[%c0_11, %c0_12] : memref<1x128xf32, #tpu.memory_space<vmem>>, vector<1x128xf32>
    %c0_13 = arith.constant 0 : index
    %c0_14 = arith.constant 0 : index
    %7 = vector.load %arg0[%c0_13, %c0_14] : memref<4x128xf32, #tpu.memory_space<vmem>>, vector<4x128xf32>
    %c0_15 = arith.constant 0 : index
    %c0_16 = arith.constant 0 : index
    %8 = vector.load %arg2[%c0_15, %c0_16] : memref<128x128xf32, #tpu.memory_space<vmem>>, vector<128x128xf32>
    %cst = arith.constant dense<0.000000e+00> : vector<4x128xf32>
    %9 = tpu.matmul %7, %8, %cst {dimension_numbers = #tpu.dot_dimension_numbers<[1], [0], [0], [1], [0, 0, 1, 1], [], []>} : vector<4x128xf32>, vector<128x128xf32>, vector<4x128xf32> -> vector<4x128xf32>
    %c0_17 = arith.constant 0 : index
    %c0_18 = arith.constant 0 : index
    %10 = vector.load %arg4[%c0_17, %c0_18] : memref<1x128xf32, #tpu.memory_space<vmem>>, vector<1x128xf32>
    %11 = vector.broadcast %10 : vector<1x128xf32> to vector<4x128xf32>
    %12 = arith.addf %9, %11 : vector<4x128xf32>
    %c0_19 = arith.constant 0 : index
    %c0_20 = arith.constant 0 : index
    %13 = vector.load %arg15[%c0_19, %c0_20] : memref<4x128xf32, #tpu.memory_space<vmem>>, vector<4x128xf32>
    tpu.vector_store %arg15[%c0_19, %c0_20], %12 {strides = array<i32>} : memref<4x128xf32, #tpu.memory_space<vmem>>, vector<4x128xf32>,
    %cst_21 = arith.constant 0.000000e+00 : f32
    %14 = vector.broadcast %cst_21 : f32 to vector<1x128xf32>
    %c0_i32 = arith.constant 0 : i32
    %c3_i32 = arith.constant 3 : i32
    %15 = arith.minsi %c0_i32, %c3_i32 : i32
    %16 = arith.index_cast %15 : i32 to index
    %c0_22 = arith.constant 0 : index
    %17 = vector.load %arg15[%16, %c0_22] : memref<4x128xf32, #tpu.memory_space<vmem>>, vector<1x128xf32>
    %18 = arith.truncf %14 : vector<1x128xf32> to vector<1x128xbf16>
    %cst_23 = arith.constant dense<0.000000e+00> : vector<1x128xf32>
    %19 = tpu.matmul %18, %0, %cst_23 {dimension_numbers = #tpu.dot_dimension_numbers<[1], [0], [0], [1], [0, 0, 1, 1], [], []>} : vector<1x128xbf16>, vector<128x128xbf16>, vector<1x128xf32> -> vector<1x128xf32>
    %20 = arith.addf %17, %19 : vector<1x128xf32>
    %21 = math.tanh %20 : vector<1x128xf32>
    %22 = arith.truncf %14 : vector<1x128xf32> to vector<1x128xbf16>
    %cst_24 = arith.constant dense<0.000000e+00> : vector<1x128xf32>
    %23 = tpu.matmul %22, %1, %cst_24 {dimension_numbers = #tpu.dot_dimension_numbers<[1], [0], [0], [1], [0, 0, 1, 1], [], []>} : vector<1x128xbf16>, vector<128x128xbf16>, vector<1x128xf32> -> vector<1x128xf32>
    %24 = arith.truncf %14 : vector<1x128xf32> to vector<1x128xbf16>
    %cst_25 = arith.constant dense<0.000000e+00> : vector<1x128xf32>
    %25 = tpu.matmul %24, %2, %cst_25 {dimension_numbers = #tpu.dot_dimension_numbers<[1], [0], [0], [1], [0, 0, 1, 1], [], []>} : vector<1x128xbf16>, vector<128x128xbf16>, vector<1x128xf32> -> vector<1x128xf32>
    %26 = arith.addf %23, %25 : vector<1x128xf32>
    %27 = arith.addf %26, %5 : vector<1x128xf32>
    %28 = math.tanh %27 : vector<1x128xf32>
    %29 = arith.truncf %14 : vector<1x128xf32> to vector<1x128xbf16>
    %cst_26 = arith.constant dense<0.000000e+00> : vector<1x128xf32>
    %30 = tpu.matmul %29, %3, %cst_26 {dimension_numbers = #tpu.dot_dimension_numbers<[1], [0], [0], [1], [0, 0, 1, 1], [], []>} : vector<1x128xbf16>, vector<128x128xbf16>, vector<1x128xf32> -> vector<1x128xf32>
    %31 = arith.truncf %14 : vector<1x128xf32> to vector<1x128xbf16>
    %cst_27 = arith.constant dense<0.000000e+00> : vector<1x128xf32>
    %32 = tpu.matmul %31, %4, %cst_27 {dimension_numbers = #tpu.dot_dimension_numbers<[1], [0], [0], [1], [0, 0, 1, 1], [], []>} : vector<1x128xbf16>, vector<128x128xbf16>, vector<1x128xf32> -> vector<1x128xf32>
    %33 = arith.addf %30, %32 : vector<1x128xf32>
    %34 = arith.addf %33, %6 : vector<1x128xf32>
    %35 = math.tanh %34 : vector<1x128xf32>
    %c1_i32 = arith.constant 1 : i32
    %36 = arith.cmpi sge, %c0_i32, %c1_i32 : i32
    %cst_28 = arith.constant 0.000000e+00 : f32
    %37 = vector.broadcast %cst_28 : f32 to vector<1x128xf32>
    %38 = arith.select %36, %28, %37 : vector<1x128xf32>
    %c2_i32 = arith.constant 2 : i32
    %39 = arith.cmpi sge, %c0_i32, %c2_i32 : i32
    %cst_29 = arith.constant 0.000000e+00 : f32
    %40 = vector.broadcast %cst_29 : f32 to vector<1x128xf32>
    %41 = arith.select %39, %35, %40 : vector<1x128xf32>
    %c2_i32_30 = arith.constant 2 : i32
    %42 = arith.subi %c0_i32, %c2_i32_30 : i32
    %c0_i32_31 = arith.constant 0 : i32
    %43 = arith.maxsi %42, %c0_i32_31 : i32
    %44 = arith.index_cast %43 : i32 to index
    %c0_32 = arith.constant 0 : index
    %45 = vector.load %arg16[%44, %c0_32] : memref<4x128xf32, #tpu.memory_space<vmem>>, vector<1x128xf32>
    tpu.vector_store %arg16[%44, %c0_32], %41 {strides = array<i32>} : memref<4x128xf32, #tpu.memory_space<vmem>>, vector<1x128xf32>,
    %c1_i32_33 = arith.constant 1 : i32
    %c3_i32_34 = arith.constant 3 : i32
    %46 = arith.minsi %c1_i32_33, %c3_i32_34 : i32
    %47 = arith.index_cast %46 : i32 to index
    %c0_35 = arith.constant 0 : index
    %48 = vector.load %arg15[%47, %c0_35] : memref<4x128xf32, #tpu.memory_space<vmem>>, vector<1x128xf32>
    %49 = arith.truncf %21 : vector<1x128xf32> to vector<1x128xbf16>
    %cst_36 = arith.constant dense<0.000000e+00> : vector<1x128xf32>
    %50 = tpu.matmul %49, %0, %cst_36 {dimension_numbers = #tpu.dot_dimension_numbers<[1], [0], [0], [1], [0, 0, 1, 1], [], []>} : vector<1x128xbf16>, vector<128x128xbf16>, vector<1x128xf32> -> vector<1x128xf32>
    %51 = arith.addf %48, %50 : vector<1x128xf32>
    %52 = math.tanh %51 : vector<1x128xf32>
    %53 = arith.truncf %21 : vector<1x128xf32> to vector<1x128xbf16>
    %cst_37 = arith.constant dense<0.000000e+00> : vector<1x128xf32>
    %54 = tpu.matmul %53, %1, %cst_37 {dimension_numbers = #tpu.dot_dimension_numbers<[1], [0], [0], [1], [0, 0, 1, 1], [], []>} : vector<1x128xbf16>, vector<128x128xbf16>, vector<1x128xf32> -> vector<1x128xf32>
    %55 = arith.truncf %38 : vector<1x128xf32> to vector<1x128xbf16>
    %cst_38 = arith.constant dense<0.000000e+00> : vector<1x128xf32>
    %56 = tpu.matmul %55, %2, %cst_38 {dimension_numbers = #tpu.dot_dimension_numbers<[1], [0], [0], [1], [0, 0, 1, 1], [], []>} : vector<1x128xbf16>, vector<128x128xbf16>, vector<1x128xf32> -> vector<1x128xf32>
    %57 = arith.addf %54, %56 : vector<1x128xf32>
    %58 = arith.addf %57, %5 : vector<1x128xf32>
    %59 = math.tanh %58 : vector<1x128xf32>
    %60 = arith.truncf %38 : vector<1x128xf32> to vector<1x128xbf16>
    %cst_39 = arith.constant dense<0.000000e+00> : vector<1x128xf32>
    %61 = tpu.matmul %60, %3, %cst_39 {dimension_numbers = #tpu.dot_dimension_numbers<[1], [0], [0], [1], [0, 0, 1, 1], [], []>} : vector<1x128xbf16>, vector<128x128xbf16>, vector<1x128xf32> -> vector<1x128xf32>
    %62 = arith.truncf %41 : vector<1x128xf32> to vector<1x128xbf16>
    %cst_40 = arith.constant dense<0.000000e+00> : vector<1x128xf32>
    %63 = tpu.matmul %62, %4, %cst_40 {dimension_numbers = #tpu.dot_dimension_numbers<[1], [0], [0], [1], [0, 0, 1, 1], [], []>} : vector<1x128xbf16>, vector<128x128xbf16>, vector<1x128xf32> -> vector<1x128xf32>
    %64 = arith.addf %61, %63 : vector<1x128xf32>
    %65 = arith.addf %64, %6 : vector<1x128xf32>
    %66 = math.tanh %65 : vector<1x128xf32>
    %c1_i32_41 = arith.constant 1 : i32
    %67 = arith.cmpi sge, %c1_i32_33, %c1_i32_41 : i32
    %cst_42 = arith.constant 0.000000e+00 : f32
    %68 = vector.broadcast %cst_42 : f32 to vector<1x128xf32>
    %69 = arith.select %67, %59, %68 : vector<1x128xf32>
    %c2_i32_43 = arith.constant 2 : i32
    %70 = arith.cmpi sge, %c1_i32_33, %c2_i32_43 : i32
    %cst_44 = arith.constant 0.000000e+00 : f32
    %71 = vector.broadcast %cst_44 : f32 to vector<1x128xf32>
    %72 = arith.select %70, %66, %71 : vector<1x128xf32>
    %c2_i32_45 = arith.constant 2 : i32
    %73 = arith.subi %c1_i32_33, %c2_i32_45 : i32
    %c0_i32_46 = arith.constant 0 : i32
    %74 = arith.maxsi %73, %c0_i32_46 : i32
    %75 = arith.index_cast %74 : i32 to index
    %c0_47 = arith.constant 0 : index
    %76 = vector.load %arg16[%75, %c0_47] : memref<4x128xf32, #tpu.memory_space<vmem>>, vector<1x128xf32>
    tpu.vector_store %arg16[%75, %c0_47], %72 {strides = array<i32>} : memref<4x128xf32, #tpu.memory_space<vmem>>, vector<1x128xf32>,
    %c2_i32_48 = arith.constant 2 : i32
    %c3_i32_49 = arith.constant 3 : i32
    %77 = arith.minsi %c2_i32_48, %c3_i32_49 : i32
    %78 = arith.index_cast %77 : i32 to index
    %c0_50 = arith.constant 0 : index
    %79 = vector.load %arg15[%78, %c0_50] : memref<4x128xf32, #tpu.memory_space<vmem>>, vector<1x128xf32>
    %80 = arith.truncf %52 : vector<1x128xf32> to vector<1x128xbf16>
    %cst_51 = arith.constant dense<0.000000e+00> : vector<1x128xf32>
    %81 = tpu.matmul %80, %0, %cst_51 {dimension_numbers = #tpu.dot_dimension_numbers<[1], [0], [0], [1], [0, 0, 1, 1], [], []>} : vector<1x128xbf16>, vector<128x128xbf16>, vector<1x128xf32> -> vector<1x128xf32>
    %82 = arith.addf %79, %81 : vector<1x128xf32>
    %83 = math.tanh %82 : vector<1x128xf32>
    %84 = arith.truncf %52 : vector<1x128xf32> to vector<1x128xbf16>
    %cst_52 = arith.constant dense<0.000000e+00> : vector<1x128xf32>
    %85 = tpu.matmul %84, %1, %cst_52 {dimension_numbers = #tpu.dot_dimension_numbers<[1], [0], [0], [1], [0, 0, 1, 1], [], []>} : vector<1x128xbf16>, vector<128x128xbf16>, vector<1x128xf32> -> vector<1x128xf32>
    %86 = arith.truncf %69 : vector<1x128xf32> to vector<1x128xbf16>
    %cst_53 = arith.constant dense<0.000000e+00> : vector<1x128xf32>
    %87 = tpu.matmul %86, %2, %cst_53 {dimension_numbers = #tpu.dot_dimension_numbers<[1], [0], [0], [1], [0, 0, 1, 1], [], []>} : vector<1x128xbf16>, vector<128x128xbf16>, vector<1x128xf32> -> vector<1x128xf32>
    %88 = arith.addf %85, %87 : vector<1x128xf32>
    %89 = arith.addf %88, %5 : vector<1x128xf32>
    %90 = math.tanh %89 : vector<1x128xf32>
    %91 = arith.truncf %69 : vector<1x128xf32> to vector<1x128xbf16>
    %cst_54 = arith.constant dense<0.000000e+00> : vector<1x128xf32>
    %92 = tpu.matmul %91, %3, %cst_54 {dimension_numbers = #tpu.dot_dimension_numbers<[1], [0], [0], [1], [0, 0, 1, 1], [], []>} : vector<1x128xbf16>, vector<128x128xbf16>, vector<1x128xf32> -> vector<1x128xf32>
    %93 = arith.truncf %72 : vector<1x128xf32> to vector<1x128xbf16>
    %cst_55 = arith.constant dense<0.000000e+00> : vector<1x128xf32>
    %94 = tpu.matmul %93, %4, %cst_55 {dimension_numbers = #tpu.dot_dimension_numbers<[1], [0], [0], [1], [0, 0, 1, 1], [], []>} : vector<1x128xbf16>, vector<128x128xbf16>, vector<1x128xf32> -> vector<1x128xf32>
    %95 = arith.addf %92, %94 : vector<1x128xf32>
    %96 = arith.addf %95, %6 : vector<1x128xf32>
    %97 = math.tanh %96 : vector<1x128xf32>
    %c1_i32_56 = arith.constant 1 : i32
    %98 = arith.cmpi sge, %c2_i32_48, %c1_i32_56 : i32
    %cst_57 = arith.constant 0.000000e+00 : f32
    %99 = vector.broadcast %cst_57 : f32 to vector<1x128xf32>
    %100 = arith.select %98, %90, %99 : vector<1x128xf32>
    %c2_i32_58 = arith.constant 2 : i32
    %101 = arith.cmpi sge, %c2_i32_48, %c2_i32_58 : i32
    %cst_59 = arith.constant 0.000000e+00 : f32
    %102 = vector.broadcast %cst_59 : f32 to vector<1x128xf32>
    %103 = arith.select %101, %97, %102 : vector<1x128xf32>
    %c2_i32_60 = arith.constant 2 : i32
    %104 = arith.subi %c2_i32_48, %c2_i32_60 : i32
    %c0_i32_61 = arith.constant 0 : i32
    %105 = arith.maxsi %104, %c0_i32_61 : i32
    %106 = arith.index_cast %105 : i32 to index
    %c0_62 = arith.constant 0 : index
    %107 = vector.load %arg16[%106, %c0_62] : memref<4x128xf32, #tpu.memory_space<vmem>>, vector<1x128xf32>
    tpu.vector_store %arg16[%106, %c0_62], %103 {strides = array<i32>} : memref<4x128xf32, #tpu.memory_space<vmem>>, vector<1x128xf32>,
    %c3_i32_63 = arith.constant 3 : i32
    %c3_i32_64 = arith.constant 3 : i32
    %108 = arith.minsi %c3_i32_63, %c3_i32_64 : i32
    %109 = arith.index_cast %108 : i32 to index
    %c0_65 = arith.constant 0 : index
    %110 = vector.load %arg15[%109, %c0_65] : memref<4x128xf32, #tpu.memory_space<vmem>>, vector<1x128xf32>
    %111 = arith.truncf %83 : vector<1x128xf32> to vector<1x128xbf16>
    %cst_66 = arith.constant dense<0.000000e+00> : vector<1x128xf32>
    %112 = tpu.matmul %111, %0, %cst_66 {dimension_numbers = #tpu.dot_dimension_numbers<[1], [0], [0], [1], [0, 0, 1, 1], [], []>} : vector<1x128xbf16>, vector<128x128xbf16>, vector<1x128xf32> -> vector<1x128xf32>
    %113 = arith.addf %110, %112 : vector<1x128xf32>
    %114 = math.tanh %113 : vector<1x128xf32>
    %115 = arith.truncf %83 : vector<1x128xf32> to vector<1x128xbf16>
    %cst_67 = arith.constant dense<0.000000e+00> : vector<1x128xf32>
    %116 = tpu.matmul %115, %1, %cst_67 {dimension_numbers = #tpu.dot_dimension_numbers<[1], [0], [0], [1], [0, 0, 1, 1], [], []>} : vector<1x128xbf16>, vector<128x128xbf16>, vector<1x128xf32> -> vector<1x128xf32>
    %117 = arith.truncf %100 : vector<1x128xf32> to vector<1x128xbf16>
    %cst_68 = arith.constant dense<0.000000e+00> : vector<1x128xf32>
    %118 = tpu.matmul %117, %2, %cst_68 {dimension_numbers = #tpu.dot_dimension_numbers<[1], [0], [0], [1], [0, 0, 1, 1], [], []>} : vector<1x128xbf16>, vector<128x128xbf16>, vector<1x128xf32> -> vector<1x128xf32>
    %119 = arith.addf %116, %118 : vector<1x128xf32>
    %120 = arith.addf %119, %5 : vector<1x128xf32>
    %121 = math.tanh %120 : vector<1x128xf32>
    %122 = arith.truncf %100 : vector<1x128xf32> to vector<1x128xbf16>
    %cst_69 = arith.constant dense<0.000000e+00> : vector<1x128xf32>
    %123 = tpu.matmul %122, %3, %cst_69 {dimension_numbers = #tpu.dot_dimension_numbers<[1], [0], [0], [1], [0, 0, 1, 1], [], []>} : vector<1x128xbf16>, vector<128x128xbf16>, vector<1x128xf32> -> vector<1x128xf32>
    %124 = arith.truncf %103 : vector<1x128xf32> to vector<1x128xbf16>
    %cst_70 = arith.constant dense<0.000000e+00> : vector<1x128xf32>
    %125 = tpu.matmul %124, %4, %cst_70 {dimension_numbers = #tpu.dot_dimension_numbers<[1], [0], [0], [1], [0, 0, 1, 1], [], []>} : vector<1x128xbf16>, vector<128x128xbf16>, vector<1x128xf32> -> vector<1x128xf32>
    %126 = arith.addf %123, %125 : vector<1x128xf32>
    %127 = arith.addf %126, %6 : vector<1x128xf32>
    %128 = math.tanh %127 : vector<1x128xf32>
    %c1_i32_71 = arith.constant 1 : i32
    %129 = arith.cmpi sge, %c3_i32_63, %c1_i32_71 : i32
    %cst_72 = arith.constant 0.000000e+00 : f32
    %130 = vector.broadcast %cst_72 : f32 to vector<1x128xf32>
    %131 = arith.select %129, %121, %130 : vector<1x128xf32>
    %c2_i32_73 = arith.constant 2 : i32
    %132 = arith.cmpi sge, %c3_i32_63, %c2_i32_73 : i32
    %cst_74 = arith.constant 0.000000e+00 : f32
    %133 = vector.broadcast %cst_74 : f32 to vector<1x128xf32>
    %134 = arith.select %132, %128, %133 : vector<1x128xf32>
    %c2_i32_75 = arith.constant 2 : i32
    %135 = arith.subi %c3_i32_63, %c2_i32_75 : i32
    %c0_i32_76 = arith.constant 0 : i32
    %136 = arith.maxsi %135, %c0_i32_76 : i32
    %137 = arith.index_cast %136 : i32 to index
    %c0_77 = arith.constant 0 : index
    %138 = vector.load %arg16[%137, %c0_77] : memref<4x128xf32, #tpu.memory_space<vmem>>, vector<1x128xf32>
    tpu.vector_store %arg16[%137, %c0_77], %134 {strides = array<i32>} : memref<4x128xf32, #tpu.memory_space<vmem>>, vector<1x128xf32>,
    %c4_i32 = arith.constant 4 : i32
    %c3_i32_78 = arith.constant 3 : i32
    %139 = arith.minsi %c4_i32, %c3_i32_78 : i32
    %140 = arith.index_cast %139 : i32 to index
    %c0_79 = arith.constant 0 : index
    %141 = vector.load %arg15[%140, %c0_79] : memref<4x128xf32, #tpu.memory_space<vmem>>, vector<1x128xf32>
    %142 = arith.truncf %114 : vector<1x128xf32> to vector<1x128xbf16>
    %cst_80 = arith.constant dense<0.000000e+00> : vector<1x128xf32>
    %143 = tpu.matmul %142, %0, %cst_80 {dimension_numbers = #tpu.dot_dimension_numbers<[1], [0], [0], [1], [0, 0, 1, 1], [], []>} : vector<1x128xbf16>, vector<128x128xbf16>, vector<1x128xf32> -> vector<1x128xf32>
    %144 = arith.addf %141, %143 : vector<1x128xf32>
    %145 = math.tanh %144 : vector<1x128xf32>
    %146 = arith.truncf %114 : vector<1x128xf32> to vector<1x128xbf16>
    %cst_81 = arith.constant dense<0.000000e+00> : vector<1x128xf32>
    %147 = tpu.matmul %146, %1, %cst_81 {dimension_numbers = #tpu.dot_dimension_numbers<[1], [0], [0], [1], [0, 0, 1, 1], [], []>} : vector<1x128xbf16>, vector<128x128xbf16>, vector<1x128xf32> -> vector<1x128xf32>
    %148 = arith.truncf %131 : vector<1x128xf32> to vector<1x128xbf16>
    %cst_82 = arith.constant dense<0.000000e+00> : vector<1x128xf32>
    %149 = tpu.matmul %148, %2, %cst_82 {dimension_numbers = #tpu.dot_dimension_numbers<[1], [0], [0], [1], [0, 0, 1, 1], [], []>} : vector<1x128xbf16>, vector<128x128xbf16>, vector<1x128xf32> -> vector<1x128xf32>
    %150 = arith.addf %147, %149 : vector<1x128xf32>
    %151 = arith.addf %150, %5 : vector<1x128xf32>
    %152 = math.tanh %151 : vector<1x128xf32>
    %153 = arith.truncf %131 : vector<1x128xf32> to vector<1x128xbf16>
    %cst_83 = arith.constant dense<0.000000e+00> : vector<1x128xf32>
    %154 = tpu.matmul %153, %3, %cst_83 {dimension_numbers = #tpu.dot_dimension_numbers<[1], [0], [0], [1], [0, 0, 1, 1], [], []>} : vector<1x128xbf16>, vector<128x128xbf16>, vector<1x128xf32> -> vector<1x128xf32>
    %155 = arith.truncf %134 : vector<1x128xf32> to vector<1x128xbf16>
    %cst_84 = arith.constant dense<0.000000e+00> : vector<1x128xf32>
    %156 = tpu.matmul %155, %4, %cst_84 {dimension_numbers = #tpu.dot_dimension_numbers<[1], [0], [0], [1], [0, 0, 1, 1], [], []>} : vector<1x128xbf16>, vector<128x128xbf16>, vector<1x128xf32> -> vector<1x128xf32>
    %157 = arith.addf %154, %156 : vector<1x128xf32>
    %158 = arith.addf %157, %6 : vector<1x128xf32>
    %159 = math.tanh %158 : vector<1x128xf32>
    %c1_i32_85 = arith.constant 1 : i32
    %160 = arith.cmpi sge, %c4_i32, %c1_i32_85 : i32
    %cst_86 = arith.constant 0.000000e+00 : f32
    %161 = vector.broadcast %cst_86 : f32 to vector<1x128xf32>
    %162 = arith.select %160, %152, %161 : vector<1x128xf32>
    %c2_i32_87 = arith.constant 2 : i32
    %163 = arith.cmpi sge, %c4_i32, %c2_i32_87 : i32
    %cst_88 = arith.constant 0.000000e+00 : f32
    %164 = vector.broadcast %cst_88 : f32 to vector<1x128xf32>
    %165 = arith.select %163, %159, %164 : vector<1x128xf32>
    %c2_i32_89 = arith.constant 2 : i32
    %166 = arith.subi %c4_i32, %c2_i32_89 : i32
    %c0_i32_90 = arith.constant 0 : i32
    %167 = arith.maxsi %166, %c0_i32_90 : i32
    %168 = arith.index_cast %167 : i32 to index
    %c0_91 = arith.constant 0 : index
    %169 = vector.load %arg16[%168, %c0_91] : memref<4x128xf32, #tpu.memory_space<vmem>>, vector<1x128xf32>
    tpu.vector_store %arg16[%168, %c0_91], %165 {strides = array<i32>} : memref<4x128xf32, #tpu.memory_space<vmem>>, vector<1x128xf32>,
    %c5_i32 = arith.constant 5 : i32
    %c3_i32_92 = arith.constant 3 : i32
    %170 = arith.minsi %c5_i32, %c3_i32_92 : i32
    %171 = arith.index_cast %170 : i32 to index
    %c0_93 = arith.constant 0 : index
    %172 = vector.load %arg15[%171, %c0_93] : memref<4x128xf32, #tpu.memory_space<vmem>>, vector<1x128xf32>
    %173 = arith.truncf %145 : vector<1x128xf32> to vector<1x128xbf16>
    %cst_94 = arith.constant dense<0.000000e+00> : vector<1x128xf32>
    %174 = tpu.matmul %173, %0, %cst_94 {dimension_numbers = #tpu.dot_dimension_numbers<[1], [0], [0], [1], [0, 0, 1, 1], [], []>} : vector<1x128xbf16>, vector<128x128xbf16>, vector<1x128xf32> -> vector<1x128xf32>
    %175 = arith.addf %172, %174 : vector<1x128xf32>
    %176 = math.tanh %175 : vector<1x128xf32>
    %177 = arith.truncf %145 : vector<1x128xf32> to vector<1x128xbf16>
    %cst_95 = arith.constant dense<0.000000e+00> : vector<1x128xf32>
    %178 = tpu.matmul %177, %1, %cst_95 {dimension_numbers = #tpu.dot_dimension_numbers<[1], [0], [0], [1], [0, 0, 1, 1], [], []>} : vector<1x128xbf16>, vector<128x128xbf16>, vector<1x128xf32> -> vector<1x128xf32>
    %179 = arith.truncf %162 : vector<1x128xf32> to vector<1x128xbf16>
    %cst_96 = arith.constant dense<0.000000e+00> : vector<1x128xf32>
    %180 = tpu.matmul %179, %2, %cst_96 {dimension_numbers = #tpu.dot_dimension_numbers<[1], [0], [0], [1], [0, 0, 1, 1], [], []>} : vector<1x128xbf16>, vector<128x128xbf16>, vector<1x128xf32> -> vector<1x128xf32>
    %181 = arith.addf %178, %180 : vector<1x128xf32>
    %182 = arith.addf %181, %5 : vector<1x128xf32>
    %183 = math.tanh %182 : vector<1x128xf32>
    %184 = arith.truncf %162 : vector<1x128xf32> to vector<1x128xbf16>
    %cst_97 = arith.constant dense<0.000000e+00> : vector<1x128xf32>
    %185 = tpu.matmul %184, %3, %cst_97 {dimension_numbers = #tpu.dot_dimension_numbers<[1], [0], [0], [1], [0, 0, 1, 1], [], []>} : vector<1x128xbf16>, vector<128x128xbf16>, vector<1x128xf32> -> vector<1x128xf32>
    %186 = arith.truncf %165 : vector<1x128xf32> to vector<1x128xbf16>
    %cst_98 = arith.constant dense<0.000000e+00> : vector<1x128xf32>
    %187 = tpu.matmul %186, %4, %cst_98 {dimension_numbers = #tpu.dot_dimension_numbers<[1], [0], [0], [1], [0, 0, 1, 1], [], []>} : vector<1x128xbf16>, vector<128x128xbf16>, vector<1x128xf32> -> vector<1x128xf32>
    %188 = arith.addf %185, %187 : vector<1x128xf32>
    %189 = arith.addf %188, %6 : vector<1x128xf32>
    %190 = math.tanh %189 : vector<1x128xf32>
    %c1_i32_99 = arith.constant 1 : i32
    %191 = arith.cmpi sge, %c5_i32, %c1_i32_99 : i32
    %cst_100 = arith.constant 0.000000e+00 : f32
    %192 = vector.broadcast %cst_100 : f32 to vector<1x128xf32>
    %193 = arith.select %191, %183, %192 : vector<1x128xf32>
    %c2_i32_101 = arith.constant 2 : i32
    %194 = arith.cmpi sge, %c5_i32, %c2_i32_101 : i32
    %cst_102 = arith.constant 0.000000e+00 : f32
    %195 = vector.broadcast %cst_102 : f32 to vector<1x128xf32>
    %196 = arith.select %194, %190, %195 : vector<1x128xf32>
    %c2_i32_103 = arith.constant 2 : i32
    %197 = arith.subi %c5_i32, %c2_i32_103 : i32
    %c0_i32_104 = arith.constant 0 : i32
    %198 = arith.maxsi %197, %c0_i32_104 : i32
    %199 = arith.index_cast %198 : i32 to index
    %c0_105 = arith.constant 0 : index
    %200 = vector.load %arg16[%199, %c0_105] : memref<4x128xf32, #tpu.memory_space<vmem>>, vector<1x128xf32>
    tpu.vector_store %arg16[%199, %c0_105], %196 {strides = array<i32>} : memref<4x128xf32, #tpu.memory_space<vmem>>, vector<1x128xf32>,
    %c6_i32 = arith.constant 6 : i32
    %c0_106 = arith.constant 0 : index
    %c0_107 = arith.constant 0 : index
    %201 = vector.load %arg16[%c0_106, %c0_107] : memref<4x128xf32, #tpu.memory_space<vmem>>, vector<4x128xf32>
    %202 = math.tanh %201 : vector<4x128xf32>
    %c0_108 = arith.constant 0 : index
    %c0_109 = arith.constant 0 : index
    %203 = vector.load %arg1[%c0_108, %c0_109] : memref<4x128xf32, #tpu.memory_space<vmem>>, vector<4x128xf32>
    %c0_110 = arith.constant 0 : index
    %c0_111 = arith.constant 0 : index
    %204 = vector.load %arg11[%c0_110, %c0_111] : memref<1x128xf32, #tpu.memory_space<vmem>>, vector<1x128xf32>
    %205 = vector.broadcast %204 : vector<1x128xf32> to vector<4x128xf32>
    %206 = arith.mulf %203, %205 : vector<4x128xf32>
    %c0_112 = arith.constant 0 : index
    %c0_113 = arith.constant 0 : index
    %207 = vector.load %arg12[%c0_112, %c0_113] : memref<1x128xf32, #tpu.memory_space<vmem>>, vector<1x128xf32>
    %208 = vector.broadcast %207 : vector<1x128xf32> to vector<4x128xf32>
    %209 = arith.mulf %202, %208 : vector<4x128xf32>
    %210 = arith.addf %206, %209 : vector<4x128xf32>
    %cst_114 = arith.constant dense<0.000000e+00> : vector<4xf32>
    %211 = vector.multi_reduction <add>, %210, %cst_114 [1] : vector<4x128xf32> to vector<4xf32>
    %212 = vector.shape_cast %211 : vector<4xf32> to vector<4x1xf32>
    %c0_115 = arith.constant 0 : index
    %c0_116 = arith.constant 0 : index
    %213 = vector.load %arg13[%c0_115, %c0_116] : memref<1x1xf32, #tpu.memory_space<vmem>>, vector<1x1xf32>
    %214 = vector.broadcast %213 : vector<1x1xf32> to vector<4x1xf32>
    %215 = arith.addf %212, %214 : vector<4x1xf32>
    %c0_117 = arith.constant 0 : index
    %c0_118 = arith.constant 0 : index
    %216 = vector.load %arg14[%c0_117, %c0_118] : memref<4x1xf32, #tpu.memory_space<vmem>>, vector<4x1xf32>
    tpu.vector_store %arg14[%c0_117, %c0_118], %215 {strides = array<i32>} : memref<4x1xf32, #tpu.memory_space<vmem>>, vector<4x1xf32>,
    return
  }
}

</mosaic_0001>

<bundles_post_ra>
// kernel: roberta_classification_head.3
= control target key start
LH: loop header
LB: loop body
LE: loop exit
PB: predicated region body
PF: predicated region fallthrough
CT: control target
= control target key end

     0   :  { %v2095_v0 = vmov 0.0   ;;  %vm2096_vm0 = vmmov 0   ;;  %v2097_v26 = vmov 0   ;;  %vm1332_vm1 = vcmask 1043456   ;;  %s2843_s2 = inlined_call_operand.vmem [shape: f32[128,128], index: 2, kind: input, shape index: {}]   ;;  %s2844_s3 = inlined_call_operand.vmem [shape: bf16[128,128], index: 3, kind: input, shape index: {}]   ;;  %s2845_s0 = inlined_call_operand.vmem [shape: f32[4,128], index: 0, kind: input, shape index: {}]   ;;  %s2846_s6 = inlined_call_operand.vmem [shape: bf16[128,128], index: 6, kind: input, shape index: {}]   ;;  %s2847_s5 = inlined_call_operand.vmem [shape: bf16[128,128], index: 5, kind: input, shape index: {}]   ;;  %s2848_s4 = inlined_call_operand.vmem [shape: f32[1,128], index: 4, kind: input, shape index: {}]   ;;  %s2849_s8 = inlined_call_operand.vmem [shape: bf16[128,128], index: 8, kind: input, shape index: {}]   ;;  %s2850_s9 = inlined_call_operand.vmem [shape: bf16[128,128], index: 9, kind: input, shape index: {}]   ;;  %s2851_s7 = inlined_call_operand.vmem [shape: f32[1,128], index: 7, kind: input, shape index: {}]   ;;  %s2852_s10 = inlined_call_operand.vmem [shape: f32[1,128], index: 10, kind: input, shape index: {}]   ;;  %s2853_s13 = inlined_call_operand.<no memory space> [shape: f32[1,1], index: 13, kind: input, shape index: {}]   ;;  %s2854_s1 = inlined_call_operand.vmem [shape: f32[4,128], index: 1, kind: input, shape index: {}]   ;;  %s2855_s11 = inlined_call_operand.vmem [shape: f32[1,128], index: 11, kind: input, shape index: {}]   ;;  %s2856_s12 = inlined_call_operand.vmem [shape: f32[1,128], index: 12, kind: input, shape index: {}]   ;;  %s2857_s14 = inlined_call_operand.vmem [shape: f32[4,1], index: 14, kind: output, shape index: {}]  }
   0x1   :  { %1591 = vmatprep.subr.mxu0 %v2095_v0  ;;  %318 = vst [vmem:[#allocation3] sm:$0x1] %v2095_v0  ;;  %v148_v1 = vld [vmem:[%s2843_s2 + $0x78] sm:$0xff]  ;;  %v147_v2 = vld [vmem:[%s2843_s2 + $0x70] sm:$0xff]  ;;  %1626 = vmatprep.subr.bf16.mxu1 %v2095_v0  ;;  %v146_v4 = vld [vmem:[%s2843_s2 + $0x68] sm:$0xff]  ;;  %vm1344_vm2 = vcmask 3072  }
   0x2   :  { %1592 = vmatpush3.msra.mxu0 %v148_v1  ;;  %541 = vst [vmem:[#allocation3] sm:$0x1] %v2095_v0  ;;  %v2186_v3 = vld [vmem:[%s2844_s3 + $0x38] sm:$0xff]   ;;  %1623 = vmatprep.mubr.msk.f32.mxu0 %vm2096_vm0, %v2095_v0  ;;  %v2200_v5 = vld [vmem:[%s2844_s3 + $0x30] sm:$0xff]   ;;  %v145_v6 = vld [vmem:[%s2843_s2 + $0x60] sm:$0xff] }
   0x3   :  { %1593 = vmatprep.subr.mxu0 %v2095_v0  ;;  %1642 = vmatprep.mubr.msk.bf16.mxu1 %vm2096_vm0, %v2095_v0  ;;  %v144_v7 = vld [vmem:[%s2843_s2 + $0x58] sm:$0xff]  ;;  %v2215_v8 = vld [vmem:[%s2844_s3 + $0x28] sm:$0xff]   ;;  %v143_v9 = vld [vmem:[%s2843_s2 + $0x50] sm:$0xff] }
   0x4   :  { %1594 = vmatpush3.msra.mxu0 %v147_v2  ;;  %1627 = vmatpush3.bf16.msra.mxu1 %v2186_v3  ;;  %v142_v10 = vld [vmem:[%s2843_s2 + $0x48] sm:$0xff]  ;;  %v2230_v11 = vld [vmem:[%s2844_s3 + $0x20] sm:$0xff]   ;;  %v140_v13 = vld [vmem:[%s2843_s2 + $0x38] sm:$0xff] }
   0x5   :  { %1595 = vmatprep.subr.mxu0 %v2095_v0  ;;  %1628 = vmatprep.subr.bf16.mxu1 %v2095_v0  ;;  %v141_v12 = vld [vmem:[%s2843_s2 + $0x40] sm:$0xff]  ;;  %v2245_v14 = vld [vmem:[%s2844_s3 + $0x18] sm:$0xff]   ;;  %v139_v15 = vld [vmem:[%s2843_s2 + $0x30] sm:$0xff] }
   0x6   :  { %1596 = vmatpush3.msra.mxu0 %v146_v4  ;;  %v138_v16 = vld [vmem:[%s2843_s2 + $0x28] sm:$0xff]  ;;  %v2260_v17 = vld [vmem:[%s2844_s3 + $0x10] sm:$0xff]   ;;  %v137_v18 = vld [vmem:[%s2843_s2 + $0x20] sm:$0xff] }
   0x7   :  { %1597 = vmatprep.subr.mxu0 %v2095_v0  ;;  %v136_v19 = vld [vmem:[%s2843_s2 + $0x18] sm:$0xff]  ;;  %v2275_v20 = vld [vmem:[%s2844_s3 + $0x8] sm:$0xff]   ;;  %v135_v21 = vld [vmem:[%s2843_s2 + $0x10] sm:$0xff] }
   0x8   :  { %1598 = vmatpush3.msra.mxu0 %v145_v6  ;;  %1629 = vmatpush3.bf16.msra.mxu1 %v2200_v5  ;;  %v134_v22 = vld [vmem:[%s2843_s2 + $0x8] sm:$0xff]  ;;  %v2290_v23 = vld [vmem:[%s2844_s3] sm:$0xff]   ;;  %v2328_v27 = vld [vmem:[%s2846_s6 + $0x38] sm:$0xff]  }
   0x9   :  { %1599 = vmatprep.subr.mxu0 %v2095_v0  ;;  %1630 = vmatprep.subr.bf16.mxu1 %v2095_v0  ;;  %v133_v24 = vld [vmem:[%s2843_s2] sm:$0xff]  ;;  %v2335_v28 = vld [vmem:[%s2846_s6 + $0x30] sm:$0xff]   ;;  %v2342_v29 = vld [vmem:[%s2846_s6 + $0x28] sm:$0xff]  }
   0xa   :  { %1600 = vmatpush3.msra.mxu0 %v144_v7  ;;  %v132_v25 = vld [vmem:[%s2845_s0] sm:$0xf]  ;;  %v2356_v31 = vld [vmem:[%s2846_s6 + $0x18] sm:$0xff]   ;;  %v2363_v32 = vld [vmem:[%s2846_s6 + $0x10] sm:$0xff]  }
   0xb   :  { %1601 = vmatprep.subr.mxu0 %v2095_v0  ;;  %v2349_v30 = vld [vmem:[%s2846_s6 + $0x20] sm:$0xff]   ;;  %v2370_v33 = vld [vmem:[%s2846_s6 + $0x8] sm:$0xff]   ;;  %v2406_v46 = vld [vmem:[%s2847_s5 + $0x38] sm:$0xff]  }
   0xc   :  { %1602 = vmatpush3.msra.mxu0 %v143_v9  ;;  %1631 = vmatpush3.bf16.msra.mxu1 %v2215_v8  ;;  %v2377_v34 = vld [vmem:[%s2846_s6] sm:$0xff]   ;;  %v2412_v48 = vld [vmem:[%s2847_s5 + $0x30] sm:$0xff]   ;;  %v2421_v49 = vld [vmem:[%s2847_s5 + $0x28] sm:$0xff]  }
   0xd   :  { %1603 = vmatprep.subr.mxu0 %v2095_v0  ;;  %1632 = vmatprep.subr.bf16.mxu1 %v2095_v0  ;;  %v1350_v35 = vld [vmem:[%s2848_s4] ss:$0 sm:$0xff]  ;;  %v2435_v51 = vld [vmem:[%s2847_s5 + $0x18] sm:$0xff]   ;;  %v2442_v52 = vld [vmem:[%s2847_s5 + $0x10] sm:$0xff]  }
   0xe   :  { %1604 = vmatpush3.msra.mxu0 %v142_v10  ;;  %v2428_v50 = vld [vmem:[%s2847_s5 + $0x20] sm:$0xff]   ;;  %v2449_v53 = vld [vmem:[%s2847_s5 + $0x8] sm:$0xff]  }
   0xf   :  { %1605 = vmatprep.subr.mxu0 %v2095_v0  ;;  %v2456_v54 = vld [vmem:[%s2847_s5] sm:$0xff]  }
  0x10   :  { %1606 = vmatpush3.msra.mxu0 %v141_v12  ;;  %1633 = vmatpush3.bf16.msra.mxu1 %v2230_v11  ;;  %v2490_v6 = vld [vmem:[%s2851_s7] sm:$0x1] }
  0x11   :  { %1607 = vmatprep.subr.mxu0 %v2095_v0  ;;  %1634 = vmatprep.subr.bf16.mxu1 %v2095_v0 }
  0x12   :  { %1608 = vmatpush3.msra.mxu0 %v140_v13 }
  0x13   :  { %1609 = vmatprep.subr.mxu0 %v2095_v0 }
  0x14   :  { %1610 = vmatpush3.msra.mxu0 %v139_v15  ;;  %1635 = vmatpush3.bf16.msra.mxu1 %v2245_v14 }
  0x15   :  { %1611 = vmatprep.subr.mxu0 %v2095_v0  ;;  %1636 = vmatprep.subr.bf16.mxu1 %v2095_v0 }
  0x16   :  { %1612 = vmatpush3.msra.mxu0 %v138_v16  ;;  %v2505_v16 = vld [vmem:[%s2849_s8 + $0x38] sm:$0xff]  }
  0x17   :  { %1613 = vmatprep.subr.mxu0 %v2095_v0 }
  0x18   :  { %1614 = vmatpush3.msra.mxu0 %v137_v18  ;;  %1637 = vmatpush3.bf16.msra.mxu1 %v2260_v17 }
  0x19   :  { %1615 = vmatprep.subr.mxu0 %v2095_v0  ;;  %1638 = vmatprep.subr.bf16.mxu1 %v2095_v0 }
  0x1a   :  { %1616 = vmatpush3.msra.mxu0 %v136_v19  ;;  %v2511_v19 = vld [vmem:[%s2850_s9 + $0x38] sm:$0xff]  }
  0x1b   :  { %1617 = vmatprep.subr.mxu0 %v2095_v0 }
  0x1c   :  { %1618 = vmatpush3.msra.mxu0 %v135_v21  ;;  %1639 = vmatpush3.bf16.msra.mxu1 %v2275_v20 }
  0x1d   :  { %1619 = vmatprep.subr.mxu0 %v2095_v0  ;;  %1640 = vmatprep.subr.bf16.mxu1 %v2095_v0 }
  0x1e   :  { %1620 = vmatpush3.msra.mxu0 %v134_v22  ;;  %v2517_v22 = vld [vmem:[%s2849_s8 + $0x30] sm:$0xff]  }
  0x1f   :  { %1621 = vmatprep.subr.mxu0 %v2095_v0 }
  0x20   :  { %1622 = vmatpush3.msra.mxu0 %v133_v24  ;;  %1641 = vmatpush3.bf16.msra.mxu1 %v2290_v23  ;;  %v2526_v24 = vld [vmem:[%s2850_s9 + $0x30] sm:$0xff]  }
  0x21   :  { %1624 = vmatmul.mubr.f32.vlgmr.msra.gmra.mxu0 %v132_v25  ;;  %1646 = vmatprep.subr.bf16.mxu0 %v2095_v0  ;;  %v2535_v25 = vld [vmem:[%s2849_s8 + $0x28] sm:$0xff]  }
  0x22   :  { %1647 = vmatpush3.bf16.msra.mxu0 %v2186_v3  ;;  %1666 = vmatprep.subr.bf16.mxu1 %v2095_v0 }
  0x23   :  { %1643 = vmatmul.mubr.bf16.vlgmr.msra.gmra.mxu1 %v2097_v26  ;;  %1648 = vmatprep.subr.bf16.mxu0 %v2095_v0 }
  0x24   :  { %1662 = vmatprep.mubr.msk.bf16.mxu0 %vm2096_vm0, %v2095_v0  ;;  %1682 = vmatprep.mubr.msk.bf16.mxu1 %vm2096_vm0, %v2095_v0 }
  0x25   :  { %1667 = vmatpush3.bf16.msra.mxu1 %v2328_v27 }
  0x26   :  { %1649 = vmatpush3.bf16.msra.mxu0 %v2200_v5  ;;  %1668 = vmatprep.subr.bf16.mxu1 %v2095_v0 }
  0x27   :  { %1650 = vmatprep.subr.bf16.mxu0 %v2095_v0 }
  0x29   :  { %1669 = vmatpush3.bf16.msra.mxu1 %v2335_v28 }
  0x2a   :  { %1651 = vmatpush3.bf16.msra.mxu0 %v2215_v8  ;;  %1670 = vmatprep.subr.bf16.mxu1 %v2095_v0 }
  0x2b   :  { %1652 = vmatprep.subr.bf16.mxu0 %v2095_v0 }
  0x2d   :  { %1671 = vmatpush3.bf16.msra.mxu1 %v2342_v29 }
  0x2e   :  { %1653 = vmatpush3.bf16.msra.mxu0 %v2230_v11  ;;  %1672 = vmatprep.subr.bf16.mxu1 %v2095_v0 }
  0x2f   :  { %1654 = vmatprep.subr.bf16.mxu0 %v2095_v0 }
  0x31   :  { %1673 = vmatpush3.bf16.msra.mxu1 %v2349_v30 }
  0x32   :  { %1655 = vmatpush3.bf16.msra.mxu0 %v2245_v14  ;;  %1674 = vmatprep.subr.bf16.mxu1 %v2095_v0 }
  0x33   :  { %1656 = vmatprep.subr.bf16.mxu0 %v2095_v0 }
  0x35   :  { %1675 = vmatpush3.bf16.msra.mxu1 %v2356_v31 }
  0x36   :  { %1657 = vmatpush3.bf16.msra.mxu0 %v2260_v17  ;;  %1676 = vmatprep.subr.bf16.mxu1 %v2095_v0 }
  0x37   :  { %1658 = vmatprep.subr.bf16.mxu0 %v2095_v0 }
  0x39   :  { %1677 = vmatpush3.bf16.msra.mxu1 %v2363_v32 }
  0x3a   :  { %1659 = vmatpush3.bf16.msra.mxu0 %v2275_v20  ;;  %1678 = vmatprep.subr.bf16.mxu1 %v2095_v0 }
  0x3b   :  { %1660 = vmatprep.subr.bf16.mxu0 %v2095_v0 }
  0x3d   :  { %1679 = vmatpush3.bf16.msra.mxu1 %v2370_v33 }
  0x3e   :  { %1661 = vmatpush3.bf16.msra.mxu0 %v2290_v23  ;;  %1680 = vmatprep.subr.bf16.mxu1 %v2095_v0 }
  0x3f   :  { %1686 = vmatprep.subr.bf16.mxu0 %v2095_v0 }
  0x41   :  { %1681 = vmatpush3.bf16.msra.mxu1 %v2377_v34 }
  0x42   :  { %1706 = vmatprep.subr.bf16.mxu1 %v2095_v0 }
  0x44   :  { %1683 = vmatmul.mubr.bf16.vlgmr.msra.gmra.mxu1 %v2097_v26 }
  0x45   :  { %1707 = vmatpush3.bf16.msra.mxu1 %v2186_v3  ;;  %1722 = vmatprep.mubr.msk.bf16.mxu1 %vm2096_vm0, %v2095_v0 }
  0x46   :  { %1708 = vmatprep.subr.bf16.mxu1 %v2095_v0 }
  0x49   :  { %1709 = vmatpush3.bf16.msra.mxu1 %v2200_v5 }
  0x4a   :  { %1710 = vmatprep.subr.bf16.mxu1 %v2095_v0 }
  0x4d   :  { %1711 = vmatpush3.bf16.msra.mxu1 %v2215_v8 }
  0x4e   :  { %1712 = vmatprep.subr.bf16.mxu1 %v2095_v0 }
  0x51   :  { %1713 = vmatpush3.bf16.msra.mxu1 %v2230_v11 }
  0x52   :  { %1714 = vmatprep.subr.bf16.mxu1 %v2095_v0 }
  0x55   :  { %1715 = vmatpush3.bf16.msra.mxu1 %v2245_v14 }
  0x56   :  { %1716 = vmatprep.subr.bf16.mxu1 %v2095_v0 }
  0x59   :  { %1717 = vmatpush3.bf16.msra.mxu1 %v2260_v17 }
  0x5a   :  { %1718 = vmatprep.subr.bf16.mxu1 %v2095_v0 }
  0x5d   :  { %1719 = vmatpush3.bf16.msra.mxu1 %v2275_v20 }
  0x5e   :  { %1720 = vmatprep.subr.bf16.mxu1 %v2095_v0 }
  0x61   :  { %1721 = vmatpush3.bf16.msra.mxu1 %v2290_v23 }
  0x62   :  { %1746 = vmatprep.subr.bf16.mxu1 %v2095_v0 }
  0xe1   :  { %v222_v36 = vpop.f32.mrf.mxu0 }
  0xe2   :  { %v223_v37 = vadd.f32 %v1350_v35, %v222_v36  ;;  %v2542_v35 = vld [vmem:[%s2850_s9 + $0x28] sm:$0xff]   ;;  %v2549_v36 = vld [vmem:[%s2849_s8 + $0x20] sm:$0xff]  }
  0xe3   :  { %v1625_v38 = vpop.f32.mrf.mxu0  ;;  %v310_v39 = vpop.f32.mrf.mxu1 }
  0xe4   :  { %226 = vst [vmem:[#allocation2] sm:$0xf] %v223_v37  ;;  %v2556_v37 = vld [vmem:[%s2850_s9 + $0x20] sm:$0xff]   ;;  %v2563_v38 = vld [vmem:[%s2849_s8 + $0x18] sm:$0xff]  }
  0xe5   :  { %v1644_v40 = vpop.f32.mrf.mxu1 }
  0xe6   :  { %v2577_v40 = vld [vmem:[%s2849_s8 + $0x10] sm:$0xff]  }
  0xe7   :  { %v313_v41 = vpop.f32.mrf.mxu1 }
  0xe8   :  { %v2584_v41 = vld [vmem:[%s2850_s9 + $0x10] sm:$0xff]  }
  0xe9   :  { %v1645_v42 = vpop.f32.mrf.mxu1 }
  0xea   :  { %v2591_v42 = vld [vmem:[%s2849_s8 + $0x8] sm:$0xff]  }
  0xeb   :  { %v227_v43 = vld [vmem:[#allocation2] sm:$0x1]  ;;  %v319_v59 = vld [vmem:[#allocation2 + $0x1] sm:$0x1] }
  0xec   :  { %v316_v44 = vadd.f32 %v310_v39, %v227_v43  ;;  %v2570_v39 = vld [vmem:[%s2850_s9 + $0x18] sm:$0xff]   ;;  %v2598_v43 = vld [vmem:[%s2850_s9 + $0x8] sm:$0xff]  }
  0xee   :  { %2069 = vtanh.f32 %v316_v44  ;;  %v2605_v44 = vld [vmem:[%s2849_s8] sm:$0xff]  }
  0xfb   :  { %v2070_v45 = vpop.eup %2069 }
  0xfc   :  { %v320_v47 = vpack.c.bf16 %v2070_v45, %v2070_v45  ;;  %v2612_v45 = vld [vmem:[%s2850_s9] sm:$0xff]  }
  0xfe   :  { %1663 = vmatmul.mubr.bf16.vlgmr.msra.gmra.mxu0 %v320_v47 }
  0xff   :  { %1687 = vmatpush3.bf16.msra.mxu0 %v2406_v46  ;;  %1702 = vmatprep.mubr.msk.bf16.mxu0 %vm2096_vm0, %v2095_v0 }
 0x100   :  { %1688 = vmatprep.subr.bf16.mxu0 %v2095_v0 }
 0x103   :  { %1689 = vmatpush3.bf16.msra.mxu0 %v2412_v48 }
 0x104   :  { %1690 = vmatprep.subr.bf16.mxu0 %v2095_v0  ;;  %v445_v55 = vpop.f32.mrf.mxu1 }
 0x106   :  { %v1684_v56 = vpop.f32.mrf.mxu1 }
 0x107   :  { %1691 = vmatpush3.bf16.msra.mxu0 %v2421_v49 }
 0x108   :  { %1692 = vmatprep.subr.bf16.mxu0 %v2095_v0  ;;  %v448_v57 = vpop.f32.mrf.mxu1 }
 0x10a   :  { %v1685_v58 = vpop.f32.mrf.mxu1 }
 0x10b   :  { %1693 = vmatpush3.bf16.msra.mxu0 %v2428_v50 }
 0x10c   :  { %1694 = vmatprep.subr.bf16.mxu0 %v2095_v0 }
 0x10f   :  { %1695 = vmatpush3.bf16.msra.mxu0 %v2435_v51 }
 0x110   :  { %1696 = vmatprep.subr.bf16.mxu0 %v2095_v0 }
 0x113   :  { %1697 = vmatpush3.bf16.msra.mxu0 %v2442_v52 }
 0x114   :  { %1698 = vmatprep.subr.bf16.mxu0 %v2095_v0 }
 0x117   :  { %1699 = vmatpush3.bf16.msra.mxu0 %v2449_v53 }
 0x118   :  { %1700 = vmatprep.subr.bf16.mxu0 %v2095_v0 }
 0x11b   :  { %1701 = vmatpush3.bf16.msra.mxu0 %v2456_v54 }
 0x11c   :  { %1726 = vmatprep.subr.bf16.mxu0 %v2095_v0 }
 0x11e   :  { %1703 = vmatmul.mubr.bf16.vlgmr.msra.gmra.mxu0 %v320_v47 }
 0x11f   :  { %1727 = vmatpush3.bf16.msra.mxu0 %v2328_v27  ;;  %1742 = vmatprep.mubr.msk.bf16.mxu0 %vm2096_vm0, %v2095_v0 }
 0x120   :  { %1728 = vmatprep.subr.bf16.mxu0 %v2095_v0 }
 0x123   :  { %1729 = vmatpush3.bf16.msra.mxu0 %v2335_v28 }
 0x124   :  { %1730 = vmatprep.subr.bf16.mxu0 %v2095_v0 }
 0x127   :  { %1731 = vmatpush3.bf16.msra.mxu0 %v2342_v29 }
 0x128   :  { %1732 = vmatprep.subr.bf16.mxu0 %v2095_v0 }
 0x12b   :  { %1733 = vmatpush3.bf16.msra.mxu0 %v2349_v30 }
 0x12c   :  { %1734 = vmatprep.subr.bf16.mxu0 %v2095_v0 }
 0x12f   :  { %1735 = vmatpush3.bf16.msra.mxu0 %v2356_v31 }
 0x130   :  { %1736 = vmatprep.subr.bf16.mxu0 %v2095_v0 }
 0x133   :  { %1737 = vmatpush3.bf16.msra.mxu0 %v2363_v32 }
 0x134   :  { %1738 = vmatprep.subr.bf16.mxu0 %v2095_v0 }
 0x137   :  { %1739 = vmatpush3.bf16.msra.mxu0 %v2370_v33 }
 0x138   :  { %1740 = vmatprep.subr.bf16.mxu0 %v2095_v0 }
 0x13b   :  { %1741 = vmatpush3.bf16.msra.mxu0 %v2377_v34 }
 0x13c   :  { %1766 = vmatprep.subr.bf16.mxu0 %v2095_v0 }
 0x1be   :  { %v355_v60 = vpop.f32.mrf.mxu0 }
 0x1bf   :  { %v361_v61 = vadd.f32 %v355_v60, %v319_v59 }
 0x1c0   :  { %v1664_v62 = vpop.f32.mrf.mxu0 }
 0x1c1   :  { %2071 = vtanh.f32 %v361_v61 }
 0x1c2   :  { %v358_v63 = vpop.f32.mrf.mxu0 }
 0x1c4   :  { %v1665_v1 = vpop.f32.mrf.mxu0 }
 0x1ce   :  { %v2072_v2 = vpop.eup %2071 }
 0x1cf   :  { %v543_v4 = vpack.c.bf16 %v2072_v2, %v2072_v2 }
 0x1d1   :  { %1723 = vmatmul.mubr.bf16.vlgmr.msra.gmra.mxu1 %v543_v4 }
 0x1d2   :  { %1747 = vmatpush3.bf16.msra.mxu1 %v2406_v46  ;;  %1762 = vmatprep.mubr.msk.bf16.mxu1 %vm2096_vm0, %v2095_v0 }
 0x1d3   :  { %1748 = vmatprep.subr.bf16.mxu1 %v2095_v0 }
 0x1d6   :  { %1749 = vmatpush3.bf16.msra.mxu1 %v2412_v48 }
 0x1d7   :  { %1750 = vmatprep.subr.bf16.mxu1 %v2095_v0 }
 0x1da   :  { %1751 = vmatpush3.bf16.msra.mxu1 %v2421_v49 }
 0x1db   :  { %1752 = vmatprep.subr.bf16.mxu1 %v2095_v0 }
 0x1de   :  { %v533_v7 = vpop.f32.mrf.mxu0  ;;  %1753 = vmatpush3.bf16.msra.mxu1 %v2428_v50 }
 0x1df   :  { %v534_v9 = vadd.f32 %v533_v7, %v445_v55  ;;  %1754 = vmatprep.subr.bf16.mxu1 %v2095_v0 }
 0x1e0   :  { %v1704_v10 = vpop.f32.mrf.mxu0 }
 0x1e1   :  { %v539_v12 = vadd.f32 %v534_v9, %v2490_v6 }
 0x1e2   :  { %v536_v13 = vpop.f32.mrf.mxu0  ;;  %1755 = vmatpush3.bf16.msra.mxu1 %v2435_v51 }
 0x1e3   :  { %2073 = vtanh.f32 %v539_v12  ;;  %1756 = vmatprep.subr.bf16.mxu1 %v2095_v0 }
 0x1e4   :  { %v1705_v15 = vpop.f32.mrf.mxu0 }
 0x1e6   :  { %1757 = vmatpush3.bf16.msra.mxu1 %v2442_v52 }
 0x1e7   :  { %1758 = vmatprep.subr.bf16.mxu1 %v2095_v0 }
 0x1ea   :  { %1759 = vmatpush3.bf16.msra.mxu1 %v2449_v53 }
 0x1eb   :  { %1760 = vmatprep.subr.bf16.mxu1 %v2095_v0 }
 0x1ee   :  { %1761 = vmatpush3.bf16.msra.mxu1 %v2456_v54 }
 0x1ef   :  { %1786 = vmatprep.subr.bf16.mxu1 %v2095_v0 }
 0x1f0   :  { %v2074_v18 = vpop.eup %2073 }
 0x1f1   :  { %v586_v21 = vpack.c.bf16 %v2074_v18, %v2074_v18  ;;  %1763 = vmatmul.mubr.bf16.vlgmr.msra.gmra.mxu1 %v543_v4  ;;  %v2696_v4 = vld [vmem:[%s2852_s10] sm:$0x1] }
 0x1f2   :  { %1787 = vmatpush3.bf16.msra.mxu1 %v2505_v16  ;;  %1802 = vmatprep.mubr.msk.bf16.mxu1 %vm2096_vm0, %v2095_v0 }
 0x1f3   :  { %1743 = vmatmul.mubr.bf16.vlgmr.msra.gmra.mxu0 %v586_v21  ;;  %1788 = vmatprep.subr.bf16.mxu1 %v2095_v0 }
 0x1f4   :  { %1767 = vmatpush3.bf16.msra.mxu0 %v2511_v19  ;;  %1782 = vmatprep.mubr.msk.bf16.mxu0 %vm2096_vm0, %v2095_v0 }
 0x1f5   :  { %1768 = vmatprep.subr.bf16.mxu0 %v2095_v0 }
 0x1f6   :  { %1789 = vmatpush3.bf16.msra.mxu1 %v2517_v22 }
 0x1f7   :  { %1790 = vmatprep.subr.bf16.mxu1 %v2095_v0 }
 0x1f8   :  { %1769 = vmatpush3.bf16.msra.mxu0 %v2526_v24 }
 0x1f9   :  { %1770 = vmatprep.subr.bf16.mxu0 %v2095_v0 }
 0x1fa   :  { %1791 = vmatpush3.bf16.msra.mxu1 %v2535_v25 }
 0x1fb   :  { %1792 = vmatprep.subr.bf16.mxu1 %v2095_v0 }
 0x1fc   :  { %1771 = vmatpush3.bf16.msra.mxu0 %v2542_v35 }
 0x1fd   :  { %1772 = vmatprep.subr.bf16.mxu0 %v2095_v0 }
 0x1fe   :  { %1793 = vmatpush3.bf16.msra.mxu1 %v2549_v36 }
 0x1ff   :  { %1794 = vmatprep.subr.bf16.mxu1 %v2095_v0 }
 0x200   :  { %1773 = vmatpush3.bf16.msra.mxu0 %v2556_v37 }
 0x201   :  { %1774 = vmatprep.subr.bf16.mxu0 %v2095_v0 }
 0x202   :  { %1795 = vmatpush3.bf16.msra.mxu1 %v2563_v38 }
 0x203   :  { %1796 = vmatprep.subr.bf16.mxu1 %v2095_v0 }
 0x204   :  { %1775 = vmatpush3.bf16.msra.mxu0 %v2570_v39 }
 0x205   :  { %1776 = vmatprep.subr.bf16.mxu0 %v2095_v0 }
 0x206   :  { %1797 = vmatpush3.bf16.msra.mxu1 %v2577_v40 }
 0x207   :  { %1798 = vmatprep.subr.bf16.mxu1 %v2095_v0 }
 0x208   :  { %1777 = vmatpush3.bf16.msra.mxu0 %v2584_v41 }
 0x209   :  { %1778 = vmatprep.subr.bf16.mxu0 %v2095_v0 }
 0x20a   :  { %1799 = vmatpush3.bf16.msra.mxu1 %v2591_v42 }
 0x20b   :  { %1800 = vmatprep.subr.bf16.mxu1 %v2095_v0 }
 0x20c   :  { %1779 = vmatpush3.bf16.msra.mxu0 %v2598_v43 }
 0x20d   :  { %1780 = vmatprep.subr.bf16.mxu0 %v2095_v0 }
 0x20e   :  { %1801 = vmatpush3.bf16.msra.mxu1 %v2605_v44 }
 0x20f   :  { %1826 = vmatprep.subr.bf16.mxu1 %v2095_v0 }
 0x210   :  { %1781 = vmatpush3.bf16.msra.mxu0 %v2612_v45 }
 0x211   :  { %1803 = vmatmul.mubr.bf16.vlgmr.msra.gmra.mxu1 %v586_v21  ;;  %1806 = vmatprep.subr.bf16.mxu0 %v2095_v0 }
 0x212   :  { %1827 = vmatpush3.bf16.msra.mxu1 %v2328_v27  ;;  %1842 = vmatprep.mubr.msk.bf16.mxu1 %vm2096_vm0, %v2095_v0 }
 0x213   :  { %1783 = vmatmul.mubr.bf16.vlgmr.msra.gmra.mxu0 %v2097_v26  ;;  %1828 = vmatprep.subr.bf16.mxu1 %v2095_v0 }
 0x214   :  { %1807 = vmatpush3.bf16.msra.mxu0 %v2186_v3  ;;  %1822 = vmatprep.mubr.msk.bf16.mxu0 %vm2096_vm0, %v2095_v0  ;;  %v542_v3 = vld [vmem:[#allocation2 + $0x2] sm:$0x1] }
 0x215   :  { %1808 = vmatprep.subr.bf16.mxu0 %v2095_v0 }
 0x216   :  { %1829 = vmatpush3.bf16.msra.mxu1 %v2335_v28 }
 0x217   :  { %1830 = vmatprep.subr.bf16.mxu1 %v2095_v0 }
 0x218   :  { %1809 = vmatpush3.bf16.msra.mxu0 %v2200_v5 }
 0x219   :  { %1810 = vmatprep.subr.bf16.mxu0 %v2095_v0 }
 0x21a   :  { %1831 = vmatpush3.bf16.msra.mxu1 %v2342_v29 }
 0x21b   :  { %1832 = vmatprep.subr.bf16.mxu1 %v2095_v0 }
 0x21c   :  { %1811 = vmatpush3.bf16.msra.mxu0 %v2215_v8 }
 0x21d   :  { %1812 = vmatprep.subr.bf16.mxu0 %v2095_v0 }
 0x21e   :  { %1833 = vmatpush3.bf16.msra.mxu1 %v2349_v30 }
 0x21f   :  { %1834 = vmatprep.subr.bf16.mxu1 %v2095_v0 }
 0x220   :  { %1813 = vmatpush3.bf16.msra.mxu0 %v2230_v11 }
 0x221   :  { %1814 = vmatprep.subr.bf16.mxu0 %v2095_v0 }
 0x222   :  { %1835 = vmatpush3.bf16.msra.mxu1 %v2356_v31 }
 0x223   :  { %1836 = vmatprep.subr.bf16.mxu1 %v2095_v0 }
 0x224   :  { %1815 = vmatpush3.bf16.msra.mxu0 %v2245_v14 }
 0x225   :  { %1816 = vmatprep.subr.bf16.mxu0 %v2095_v0 }
 0x226   :  { %1837 = vmatpush3.bf16.msra.mxu1 %v2363_v32 }
 0x227   :  { %1838 = vmatprep.subr.bf16.mxu1 %v2095_v0 }
 0x228   :  { %1817 = vmatpush3.bf16.msra.mxu0 %v2260_v17 }
 0x229   :  { %1818 = vmatprep.subr.bf16.mxu0 %v2095_v0 }
 0x22a   :  { %1839 = vmatpush3.bf16.msra.mxu1 %v2370_v33 }
 0x22b   :  { %1840 = vmatprep.subr.bf16.mxu1 %v2095_v0 }
 0x22c   :  { %1819 = vmatpush3.bf16.msra.mxu0 %v2275_v20 }
 0x22d   :  { %1820 = vmatprep.subr.bf16.mxu0 %v2095_v0 }
 0x22e   :  { %1841 = vmatpush3.bf16.msra.mxu1 %v2377_v34 }
 0x22f   :  { %1866 = vmatprep.subr.bf16.mxu1 %v2095_v0 }
 0x230   :  { %1821 = vmatpush3.bf16.msra.mxu0 %v2290_v23 }
 0x231   :  { %1846 = vmatprep.subr.bf16.mxu0 %v2095_v0 }
 0x291   :  { %v578_v5 = vpop.f32.mrf.mxu1 }
 0x292   :  { %v584_v8 = vadd.f32 %v578_v5, %v542_v3 }
 0x293   :  { %v1724_v11 = vpop.f32.mrf.mxu1 }
 0x294   :  { %2075 = vtanh.f32 %v584_v8 }
 0x295   :  { %v581_v14 = vpop.f32.mrf.mxu1 }
 0x297   :  { %v1725_v17 = vpop.f32.mrf.mxu1 }
 0x2a1   :  { %v2076_v26 = vpop.eup %2075 }
 0x2a2   :  { %v849_v47 = vpack.c.bf16 %v2076_v26, %v2076_v26 }
 0x2a4   :  { %1823 = vmatmul.mubr.bf16.vlgmr.msra.gmra.mxu0 %v849_v47 }
 0x2a5   :  { %1847 = vmatpush3.bf16.msra.mxu0 %v2406_v46  ;;  %1862 = vmatprep.mubr.msk.bf16.mxu0 %vm2096_vm0, %v2095_v0 }
 0x2a6   :  { %1848 = vmatprep.subr.bf16.mxu0 %v2095_v0 }
 0x2a9   :  { %1849 = vmatpush3.bf16.msra.mxu0 %v2412_v48 }
 0x2aa   :  { %1850 = vmatprep.subr.bf16.mxu0 %v2095_v0 }
 0x2ad   :  { %1851 = vmatpush3.bf16.msra.mxu0 %v2421_v49 }
 0x2ae   :  { %1852 = vmatprep.subr.bf16.mxu0 %v2095_v0 }
 0x2b1   :  { %v661_v20 = vpop.f32.mrf.mxu1  ;;  %1853 = vmatpush3.bf16.msra.mxu0 %v2428_v50 }
 0x2b2   :  { %1854 = vmatprep.subr.bf16.mxu0 %v2095_v0 }
 0x2b3   :  { %v621_v23 = vpop.f32.mrf.mxu0  ;;  %v1764_v55 = vpop.f32.mrf.mxu1 }
 0x2b4   :  { %v662_v56 = vadd.f32 %v661_v20, %v621_v23 }
 0x2b5   :  { %v1744_v57 = vpop.f32.mrf.mxu0  ;;  %v664_v58 = vpop.f32.mrf.mxu1  ;;  %1855 = vmatpush3.bf16.msra.mxu0 %v2435_v51 }
 0x2b6   :  { %v667_v59 = vadd.f32 %v662_v56, %v2490_v6  ;;  %1856 = vmatprep.subr.bf16.mxu0 %v2095_v0 }
 0x2b7   :  { %v624_v60 = vpop.f32.mrf.mxu0  ;;  %v1765_v61 = vpop.f32.mrf.mxu1 }
 0x2b8   :  { %2077 = vtanh.f32 %v667_v59 }
 0x2b9   :  { %v1745_v62 = vpop.f32.mrf.mxu0  ;;  %1857 = vmatpush3.bf16.msra.mxu0 %v2442_v52 }
 0x2ba   :  { %1858 = vmatprep.subr.bf16.mxu0 %v2095_v0 }
 0x2bd   :  { %1859 = vmatpush3.bf16.msra.mxu0 %v2449_v53 }
 0x2be   :  { %1860 = vmatprep.subr.bf16.mxu0 %v2095_v0 }
 0x2c1   :  { %1861 = vmatpush3.bf16.msra.mxu0 %v2456_v54 }
 0x2c2   :  { %1886 = vmatprep.subr.bf16.mxu0 %v2095_v0 }
 0x2c4   :  { %1863 = vmatmul.mubr.bf16.vlgmr.msra.gmra.mxu0 %v849_v47 }
 0x2c5   :  { %v2078_v63 = vpop.eup %2077  ;;  %1887 = vmatpush3.bf16.msra.mxu0 %v2505_v16  ;;  %1902 = vmatprep.mubr.msk.bf16.mxu0 %vm2096_vm0, %v2095_v0 }
 0x2c6   :  { %v892_v1 = vpack.c.bf16 %v2078_v63, %v2078_v63  ;;  %1888 = vmatprep.subr.bf16.mxu0 %v2095_v0 }
 0x2c8   :  { %1843 = vmatmul.mubr.bf16.vlgmr.msra.gmra.mxu1 %v892_v1 }
 0x2c9   :  { %1867 = vmatpush3.bf16.msra.mxu1 %v2511_v19  ;;  %1889 = vmatpush3.bf16.msra.mxu0 %v2517_v22 }
 0x2ca   :  { %1868 = vmatprep.subr.bf16.mxu1 %v2095_v0  ;;  %1890 = vmatprep.subr.bf16.mxu0 %v2095_v0 }
 0x2cb   :  { %1882 = vmatprep.mubr.msk.bf16.mxu1 %vm2096_vm0, %v2095_v0 }
 0x2cd   :  { %1869 = vmatpush3.bf16.msra.mxu1 %v2526_v24  ;;  %1891 = vmatpush3.bf16.msra.mxu0 %v2535_v25 }
 0x2ce   :  { %1870 = vmatprep.subr.bf16.mxu1 %v2095_v0  ;;  %1892 = vmatprep.subr.bf16.mxu0 %v2095_v0 }
 0x2d1   :  { %1871 = vmatpush3.bf16.msra.mxu1 %v2542_v35  ;;  %v839_v2 = vpop.f32.mrf.mxu1  ;;  %1893 = vmatpush3.bf16.msra.mxu0 %v2549_v36 }
 0x2d2   :  { %1872 = vmatprep.subr.bf16.mxu1 %v2095_v0  ;;  %1894 = vmatprep.subr.bf16.mxu0 %v2095_v0 }
 0x2d3   :  { %v751_v7 = vpop.f32.mrf.mxu0  ;;  %v1804_v9 = vpop.f32.mrf.mxu1 }
 0x2d4   :  { %v840_v10 = vadd.f32 %v839_v2, %v751_v7 }
 0x2d5   :  { %v1784_v12 = vpop.f32.mrf.mxu0  ;;  %1873 = vmatpush3.bf16.msra.mxu1 %v2556_v37  ;;  %v842_v13 = vpop.f32.mrf.mxu1  ;;  %1895 = vmatpush3.bf16.msra.mxu0 %v2563_v38 }
 0x2d6   :  { %v845_v15 = vadd.f32 %v840_v10, %v2696_v4  ;;  %1874 = vmatprep.subr.bf16.mxu1 %v2095_v0  ;;  %1896 = vmatprep.subr.bf16.mxu0 %v2095_v0 }
 0x2d7   :  { %v754_v18 = vpop.f32.mrf.mxu0  ;;  %v1805_v21 = vpop.f32.mrf.mxu1 }
 0x2d8   :  { %2079 = vtanh.f32 %v845_v15 }
 0x2d9   :  { %v1785_v3 = vpop.f32.mrf.mxu0  ;;  %1875 = vmatpush3.bf16.msra.mxu1 %v2570_v39  ;;  %1897 = vmatpush3.bf16.msra.mxu0 %v2577_v40 }
 0x2da   :  { %1876 = vmatprep.subr.bf16.mxu1 %v2095_v0  ;;  %1898 = vmatprep.subr.bf16.mxu0 %v2095_v0 }
 0x2dd   :  { %1877 = vmatpush3.bf16.msra.mxu1 %v2584_v41  ;;  %1899 = vmatpush3.bf16.msra.mxu0 %v2591_v42 }
 0x2de   :  { %1878 = vmatprep.subr.bf16.mxu1 %v2095_v0  ;;  %1900 = vmatprep.subr.bf16.mxu0 %v2095_v0 }
 0x2e1   :  { %1879 = vmatpush3.bf16.msra.mxu1 %v2598_v43  ;;  %1901 = vmatpush3.bf16.msra.mxu0 %v2605_v44 }
 0x2e2   :  { %1880 = vmatprep.subr.bf16.mxu1 %v2095_v0  ;;  %1926 = vmatprep.subr.bf16.mxu0 %v2095_v0 }
 0x2e4   :  { %1903 = vmatmul.mubr.bf16.vlgmr.msra.gmra.mxu0 %v892_v1 }
 0x2e5   :  { %v2080_v5 = vpop.eup %2079  ;;  %1881 = vmatpush3.bf16.msra.mxu1 %v2612_v45  ;;  %1927 = vmatpush3.bf16.msra.mxu0 %v2406_v46 }
 0x2e6   :  { %847 = vst [vmem:[#allocation3] sm:$0x1] %v2080_v5  ;;  %v975_v8 = vpack.c.bf16 %v2080_v5, %v2080_v5  ;;  %1928 = vmatprep.subr.bf16.mxu0 %v2095_v0  ;;  %1942 = vmatprep.mubr.msk.bf16.mxu0 %vm2096_vm0, %v2095_v0 }
 0x2e7   :  { %1906 = vmatprep.subr.bf16.mxu1 %v2095_v0 }
 0x2e8   :  { %1883 = vmatmul.mubr.bf16.vlgmr.msra.gmra.mxu1 %v975_v8 }
 0x2e9   :  { %1929 = vmatpush3.bf16.msra.mxu0 %v2412_v48  ;;  %1907 = vmatpush3.bf16.msra.mxu1 %v2328_v27  ;;  %v848_v27 = vld [vmem:[#allocation2 + $0x3] sm:$0x1] }
 0x2ea   :  { %1930 = vmatprep.subr.bf16.mxu0 %v2095_v0  ;;  %1908 = vmatprep.subr.bf16.mxu1 %v2095_v0 }
 0x2eb   :  { %1922 = vmatprep.mubr.msk.bf16.mxu1 %vm2096_vm0, %v2095_v0 }
 0x2ed   :  { %1931 = vmatpush3.bf16.msra.mxu0 %v2421_v49  ;;  %1909 = vmatpush3.bf16.msra.mxu1 %v2335_v28 }
 0x2ee   :  { %1932 = vmatprep.subr.bf16.mxu0 %v2095_v0  ;;  %1910 = vmatprep.subr.bf16.mxu1 %v2095_v0 }
 0x2f1   :  { %1933 = vmatpush3.bf16.msra.mxu0 %v2428_v50  ;;  %1911 = vmatpush3.bf16.msra.mxu1 %v2342_v29 }
 0x2f2   :  { %1934 = vmatprep.subr.bf16.mxu0 %v2095_v0  ;;  %1912 = vmatprep.subr.bf16.mxu1 %v2095_v0 }
 0x2f5   :  { %1935 = vmatpush3.bf16.msra.mxu0 %v2435_v51  ;;  %1913 = vmatpush3.bf16.msra.mxu1 %v2349_v30 }
 0x2f6   :  { %1936 = vmatprep.subr.bf16.mxu0 %v2095_v0  ;;  %1914 = vmatprep.subr.bf16.mxu1 %v2095_v0 }
 0x2f9   :  { %1937 = vmatpush3.bf16.msra.mxu0 %v2442_v52  ;;  %1915 = vmatpush3.bf16.msra.mxu1 %v2356_v31 }
 0x2fa   :  { %1938 = vmatprep.subr.bf16.mxu0 %v2095_v0  ;;  %1916 = vmatprep.subr.bf16.mxu1 %v2095_v0 }
 0x2fd   :  { %1939 = vmatpush3.bf16.msra.mxu0 %v2449_v53  ;;  %1917 = vmatpush3.bf16.msra.mxu1 %v2363_v32 }
 0x2fe   :  { %1940 = vmatprep.subr.bf16.mxu0 %v2095_v0  ;;  %1918 = vmatprep.subr.bf16.mxu1 %v2095_v0 }
 0x301   :  { %1941 = vmatpush3.bf16.msra.mxu0 %v2456_v54  ;;  %1919 = vmatpush3.bf16.msra.mxu1 %v2370_v33 }
 0x302   :  { %1966 = vmatprep.subr.bf16.mxu0 %v2095_v0  ;;  %1920 = vmatprep.subr.bf16.mxu1 %v2095_v0 }
 0x305   :  { %1921 = vmatpush3.bf16.msra.mxu1 %v2377_v34 }
 0x306   :  { %1946 = vmatprep.subr.bf16.mxu1 %v2095_v0 }
 0x364   :  { %v884_v28 = vpop.f32.mrf.mxu0 }
 0x365   :  { %v890_v29 = vadd.f32 %v884_v28, %v848_v27 }
 0x366   :  { %v1824_v30 = vpop.f32.mrf.mxu0 }
 0x367   :  { %2081 = vtanh.f32 %v890_v29 }
 0x368   :  { %v887_v31 = vpop.f32.mrf.mxu0 }
 0x36a   :  { %v1825_v32 = vpop.f32.mrf.mxu0 }
 0x374   :  { %v2082_v46 = vpop.eup %2081 }
 0x375   :  { %v1059_v48 = vpack.c.bf16 %v2082_v46, %v2082_v46  ;;  %v1314_v46 = vld [vmem:[%s2854_s1] sm:$0xf] }
 0x377   :  { %1943 = vmatmul.mubr.bf16.vlgmr.msra.gmra.mxu0 %v1059_v48  ;;  %v1391_v48 = vld [vmem:[%s2855_s11] ss:$0 sm:$0xff] }
 0x378   :  { %1967 = vmatpush3.bf16.msra.mxu0 %v2505_v16  ;;  %1982 = vmatprep.mubr.msk.bf16.mxu0 %vm2096_vm0, %v2095_v0 }
 0x379   :  { %1968 = vmatprep.subr.bf16.mxu0 %v2095_v0 }
 0x37c   :  { %1969 = vmatpush3.bf16.msra.mxu0 %v2517_v22 }
 0x37d   :  { %1970 = vmatprep.subr.bf16.mxu0 %v2095_v0 }
 0x380   :  { %1971 = vmatpush3.bf16.msra.mxu0 %v2535_v25 }
 0x381   :  { %1972 = vmatprep.subr.bf16.mxu0 %v2095_v0 }
 0x384   :  { %v967_v33 = vpop.f32.mrf.mxu0  ;;  %1973 = vmatpush3.bf16.msra.mxu0 %v2549_v36 }
 0x385   :  { %1974 = vmatprep.subr.bf16.mxu0 %v2095_v0 }
 0x386   :  { %v1864_v34 = vpop.f32.mrf.mxu0 }
 0x388   :  { %v927_v49 = vpop.f32.mrf.mxu1  ;;  %v970_v50 = vpop.f32.mrf.mxu0  ;;  %1975 = vmatpush3.bf16.msra.mxu0 %v2563_v38 }
 0x389   :  { %v968_v51 = vadd.f32 %v967_v33, %v927_v49  ;;  %1976 = vmatprep.subr.bf16.mxu0 %v2095_v0  ;;  %v1392_v33 = vld [vmem:[%s2856_s12] ss:$0 sm:$0xff] }
 0x38a   :  { %v1844_v52 = vpop.f32.mrf.mxu1  ;;  %v1865_v53 = vpop.f32.mrf.mxu0 }
 0x38b   :  { %v973_v54 = vadd.f32 %v968_v51, %v2490_v6 }
 0x38c   :  { %v930_v11 = vpop.f32.mrf.mxu1  ;;  %1977 = vmatpush3.bf16.msra.mxu0 %v2577_v40 }
 0x38d   :  { %2083 = vtanh.f32 %v973_v54  ;;  %1978 = vmatprep.subr.bf16.mxu0 %v2095_v0 }
 0x38e   :  { %v1845_v14 = vpop.f32.mrf.mxu1 }
 0x390   :  { %1979 = vmatpush3.bf16.msra.mxu0 %v2591_v42 }
 0x391   :  { %1980 = vmatprep.subr.bf16.mxu0 %v2095_v0 }
 0x394   :  { %1981 = vmatpush3.bf16.msra.mxu0 %v2605_v44 }
 0x395   :  { %2006 = vmatprep.subr.bf16.mxu0 %v2095_v0 }
 0x39a   :  { %v2084_v17 = vpop.eup %2083 }
 0x39b   :  { %v1060_v26 = vpack.c.bf16 %v2084_v17, %v2084_v17 }
 0x39d   :  { %1923 = vmatmul.mubr.bf16.vlgmr.msra.gmra.mxu1 %v1060_v26  ;;  %1983 = vmatmul.mubr.bf16.vlgmr.msra.gmra.mxu0 %v1060_v26 }
 0x39e   :  { %1947 = vmatpush3.bf16.msra.mxu1 %v2511_v19  ;;  %1962 = vmatprep.mubr.msk.bf16.mxu1 %vm2096_vm0, %v2095_v0 }
 0x39f   :  { %1948 = vmatprep.subr.bf16.mxu1 %v2095_v0  ;;  %2007 = vmatpush3.bf16.msra.mxu0 %v2505_v16 }
 0x3a0   :  { %2008 = vmatprep.subr.bf16.mxu0 %v2095_v0  ;;  %2022 = vmatprep.mubr.msk.bf16.mxu0 %vm2096_vm0, %v2095_v0 }
 0x3a2   :  { %1949 = vmatpush3.bf16.msra.mxu1 %v2526_v24 }
 0x3a3   :  { %1950 = vmatprep.subr.bf16.mxu1 %v2095_v0  ;;  %2009 = vmatpush3.bf16.msra.mxu0 %v2517_v22 }
 0x3a4   :  { %v1050_v47 = vpop.f32.mrf.mxu0  ;;  %2010 = vmatprep.subr.bf16.mxu0 %v2095_v0 }
 0x3a6   :  { %1951 = vmatpush3.bf16.msra.mxu1 %v2542_v35  ;;  %v1904_v20 = vpop.f32.mrf.mxu0 }
 0x3a7   :  { %1952 = vmatprep.subr.bf16.mxu1 %v2095_v0  ;;  %2011 = vmatpush3.bf16.msra.mxu0 %v2535_v25 }
 0x3a8   :  { %v1010_v16 = vpop.f32.mrf.mxu1  ;;  %v1053_v23 = vpop.f32.mrf.mxu0  ;;  %2012 = vmatprep.subr.bf16.mxu0 %v2095_v0 }
 0x3a9   :  { %v1051_v55 = vadd.f32 %v1050_v47, %v1010_v16 }
 0x3aa   :  { %v1884_v56 = vpop.f32.mrf.mxu1  ;;  %1953 = vmatpush3.bf16.msra.mxu1 %v2556_v37  ;;  %v1905_v57 = vpop.f32.mrf.mxu0 }
 0x3ab   :  { %v1056_v22 = vadd.f32 %v1051_v55, %v2696_v4  ;;  %1954 = vmatprep.subr.bf16.mxu1 %v2095_v0  ;;  %2013 = vmatpush3.bf16.msra.mxu0 %v2549_v36 }
 0x3ac   :  { %v1013_v58 = vpop.f32.mrf.mxu1  ;;  %2014 = vmatprep.subr.bf16.mxu0 %v2095_v0 }
 0x3ad   :  { %2085 = vtanh.f32 %v1056_v22 }
 0x3ae   :  { %v1885_v25 = vpop.f32.mrf.mxu1  ;;  %1955 = vmatpush3.bf16.msra.mxu1 %v2570_v39 }
 0x3af   :  { %1956 = vmatprep.subr.bf16.mxu1 %v2095_v0  ;;  %2015 = vmatpush3.bf16.msra.mxu0 %v2563_v38 }
 0x3b0   :  { %2016 = vmatprep.subr.bf16.mxu0 %v2095_v0 }
 0x3b2   :  { %1957 = vmatpush3.bf16.msra.mxu1 %v2584_v41 }
 0x3b3   :  { %1958 = vmatprep.subr.bf16.mxu1 %v2095_v0  ;;  %2017 = vmatpush3.bf16.msra.mxu0 %v2577_v40 }
 0x3b4   :  { %2018 = vmatprep.subr.bf16.mxu0 %v2095_v0 }
 0x3b6   :  { %1959 = vmatpush3.bf16.msra.mxu1 %v2598_v43 }
 0x3b7   :  { %1960 = vmatprep.subr.bf16.mxu1 %v2095_v0  ;;  %2019 = vmatpush3.bf16.msra.mxu0 %v2591_v42 }
 0x3b8   :  { %2020 = vmatprep.subr.bf16.mxu0 %v2095_v0 }
 0x3ba   :  { %v2086_v36 = vpop.eup %2085  ;;  %1961 = vmatpush3.bf16.msra.mxu1 %v2612_v45 }
 0x3bb   :  { %1058 = vst [vmem:[#allocation3 + $0x1] sm:$0x1] %v2086_v36  ;;  %v1143_v38 = vpack.c.bf16 %v2086_v36, %v2086_v36  ;;  %2021 = vmatpush3.bf16.msra.mxu0 %v2605_v44  ;;  %1986 = vmatprep.subr.bf16.mxu1 %v2095_v0 }
 0x3bd   :  { %1963 = vmatmul.mubr.bf16.vlgmr.msra.gmra.mxu1 %v1143_v38 }
 0x3be   :  { %1987 = vmatpush3.bf16.msra.mxu1 %v2511_v19  ;;  %2002 = vmatprep.mubr.msk.bf16.mxu1 %vm2096_vm0, %v2095_v0 }
 0x3bf   :  { %1988 = vmatprep.subr.bf16.mxu1 %v2095_v0 }
 0x3c2   :  { %1989 = vmatpush3.bf16.msra.mxu1 %v2526_v24 }
 0x3c3   :  { %1990 = vmatprep.subr.bf16.mxu1 %v2095_v0 }
 0x3c6   :  { %1991 = vmatpush3.bf16.msra.mxu1 %v2542_v35 }
 0x3c7   :  { %1992 = vmatprep.subr.bf16.mxu1 %v2095_v0 }
 0x3ca   :  { %1993 = vmatpush3.bf16.msra.mxu1 %v2556_v37 }
 0x3cb   :  { %1994 = vmatprep.subr.bf16.mxu1 %v2095_v0 }
 0x3ce   :  { %1995 = vmatpush3.bf16.msra.mxu1 %v2570_v39 }
 0x3cf   :  { %1996 = vmatprep.subr.bf16.mxu1 %v2095_v0 }
 0x3d2   :  { %1997 = vmatpush3.bf16.msra.mxu1 %v2584_v41 }
 0x3d3   :  { %1998 = vmatprep.subr.bf16.mxu1 %v2095_v0 }
 0x3d6   :  { %1999 = vmatpush3.bf16.msra.mxu1 %v2598_v43 }
 0x3d7   :  { %2000 = vmatprep.subr.bf16.mxu1 %v2095_v0 }
 0x3da   :  { %2001 = vmatpush3.bf16.msra.mxu1 %v2612_v45 }
 0x437   :  { %v1135_v19 = vpop.f32.mrf.mxu0 }
 0x439   :  { %v1944_v24 = vpop.f32.mrf.mxu0 }
 0x43b   :  { %v1138_v35 = vpop.f32.mrf.mxu0 }
 0x43d   :  { %v1945_v37 = vpop.f32.mrf.mxu0 }
 0x45d   :  { %v1095_v40 = vpop.f32.mrf.mxu1  ;;  %v1218_v42 = vpop.f32.mrf.mxu0 }
 0x45e   :  { %v1136_v44 = vadd.f32 %v1135_v19, %v1095_v40 }
 0x45f   :  { %v1924_v39 = vpop.f32.mrf.mxu1  ;;  %v1984_v59 = vpop.f32.mrf.mxu0 }
 0x460   :  { %v1141_v60 = vadd.f32 %v1136_v44, %v2490_v6  ;;  %v19_v6 = vstv %s2853_s13 }
 0x461   :  { %v1098_v41 = vpop.f32.mrf.mxu1  ;;  %v1221_v61 = vpop.f32.mrf.mxu0  ;;  %20 = vst [vmem:[#allocation4] sm:$0x1] %v19_v6 }
 0x462   :  { %2087 = vtanh.f32 %v1141_v60 }
 0x463   :  { %v1925_v62 = vpop.f32.mrf.mxu1  ;;  %v1985_v43 = vpop.f32.mrf.mxu0 }
 0x468   :  { %v1393_v52 = vld [vmem:[#allocation4] ss:$0 sm:$0xff] }
 0x46f   :  { %v2088_v63 = vpop.eup %2087 }
 0x470   :  { %v1227_v0 = vpack.c.bf16 %v2088_v63, %v2088_v63 }
 0x472   :  { %2023 = vmatmul.mubr.bf16.vlgmr.msra.gmra.mxu0 %v1227_v0 }
 0x47d   :  { %v1178_v45 = vpop.f32.mrf.mxu1 }
 0x47e   :  { %v1219_v1 = vadd.f32 %v1218_v42, %v1178_v45 }
 0x47f   :  { %v1964_v2 = vpop.f32.mrf.mxu1 }
 0x480   :  { %v1224_v7 = vadd.f32 %v1219_v1, %v2696_v4 }
 0x481   :  { %v1181_v9 = vpop.f32.mrf.mxu1 }
 0x482   :  { %2089 = vtanh.f32 %v1224_v7 }
 0x483   :  { %v1965_v10 = vpop.f32.mrf.mxu1 }
 0x48f   :  { %v2090_v12 = vpop.eup %2089 }
 0x490   :  { %1226 = vst [vmem:[#allocation3 + $0x2] sm:$0x1] %v2090_v12  ;;  %v1228_v13 = vpack.c.bf16 %v2090_v12, %v2090_v12 }
 0x492   :  { %2003 = vmatmul.mubr.bf16.vlgmr.msra.gmra.mxu1 %v1228_v13 }
 0x532   :  { %v1303_v15 = vpop.f32.mrf.mxu0 }
 0x534   :  { %v2024_v18 = vpop.f32.mrf.mxu0 }
 0x536   :  { %v1306_v21 = vpop.f32.mrf.mxu0 }
 0x538   :  { %v2025_v3 = vpop.f32.mrf.mxu0 }
 0x552   :  { %v1263_v5 = vpop.f32.mrf.mxu1 }
 0x553   :  { %v1304_v8 = vadd.f32 %v1303_v15, %v1263_v5 }
 0x554   :  { %v2004_v27 = vpop.f32.mrf.mxu1 }
 0x555   :  { %v1309_v28 = vadd.f32 %v1304_v8, %v2696_v4  ;;  %v1322_v4 = vmul.f32 %v1391_v48, %v1314_v46 }
 0x556   :  { %v1266_v29 = vpop.f32.mrf.mxu1 }
 0x557   :  { %2091 = vtanh.f32 %v1309_v28 }
 0x558   :  { %v2005_v30 = vpop.f32.mrf.mxu1 }
 0x564   :  { %v2092_v31 = vpop.eup %2091 }
 0x565   :  { %1311 = vst [vmem:[#allocation3 + $0x3] sm:$0x1] %v2092_v31 }
 0x56c   :  { %v1312_v32 = vld [vmem:[#allocation3] sm:$0xf] }
 0x56d   :  { %2093 = vtanh.f32 %v1312_v32 }
 0x57a   :  { %v2094_v34 = vpop.eup %2093 }
 0x57b   :  { %v1330_v49 = vmul.f32 %v2094_v34, %v1392_v33 }
 0x57d   :  { %v1331_v50 = vadd.f32 %v1330_v49, %v1322_v4 }
 0x57f   :  { %v1333_v51 = vsel %vm1332_vm1, %v1331_v50, 0.0 }
 0x580   :  { %1334 = vadd.xlane.f32.xlu0 %v1333_v51 }
 0x609   :  { %v1335_v53 = vpop.xlane.xlu0 %1334 }
 0x60a   :  { %v1343_v54 = vadd.f32 %v1393_v52, %v1335_v53 }
 0x60c   :  { %1345 = vst.msk [vmem:[%s2857_s14] sm:$0xf] %vm1344_vm2, %v1343_v54 }

// kernel: roberta_classification_head.2
= control target key start
LH: loop header
LB: loop body
LE: loop exit
PB: predicated region body
PF: predicated region fallthrough
CT: control target
= control target key end

     0   :  { %vm1367_vm0 = vcmask 1048064   ;;  %vm1458_vm2 = vcmask 1041409   ;;  %vm1460_vm3 = vcmask 1042434   ;;  %vm1462_vm4 = vcmask 1043459   ;;  %s2841_s1 = inlined_call_operand.vmem [shape: bf16[768,384], index: 1, kind: input, shape index: {}]   ;;  %s2842_s0 = inlined_call_operand.vmem [shape: f32[4,8,768], index: 0, kind: input, shape index: {}]   ;;  %s2843_s3 = inlined_call_operand.vmem [shape: f32[192,128], index: 3, kind: input, shape index: {}]   ;;  %s2844_s2 = inlined_call_operand.vmem [shape: f32[1,192], index: 2, kind: input, shape index: {}]   ;;  %s2845_s4 = inlined_call_operand.vmem [shape: f32[1,128], index: 4, kind: input, shape index: {}]   ;;  %s2846_s5 = inlined_call_operand.vmem [shape: f32[4,128], index: 5, kind: output, shape index: {}]  }
   0x1   :  { %v1846_v0 = vld [vmem:[%s2841_s1 + $0xac] ss:$12 sps:$4 sm:$0xff]   ;;  %v1850_v2 = vld [vmem:[%s2841_s1 + $0xa8] ss:$12 sps:$4 sm:$0xff]   ;;  %v1856_v6 = vld [vmem:[%s2841_s1 + $0x90] ss:$12 sps:$4 sm:$0xff]  }
   0x2   :  { %v1848_v1 = vld [vmem:[%s2841_s1 + $0x22c] ss:$12 sps:$4 sm:$0xff]   ;;  %1017 = vmatprep.subr.bf16.mxu0 %v1846_v0  ;;  %v1851_v3 = vld [vmem:[%s2841_s1 + $0x228] ss:$12 sps:$4 sm:$0xff]   ;;  %v1857_v7 = vld [vmem:[%s2841_s1 + $0x210] ss:$12 sps:$4 sm:$0xff]  }
   0x3   :  { %1070 = vmatprep.subr.bf16.mxu1 %v1848_v1  ;;  %v1852_v4 = vld [vmem:[%s2841_s1 + $0x94] ss:$12 sps:$4 sm:$0xff]   ;;  %1018 = vmatpush1.bf16.msra.mxu0 %v1850_v2  ;;  %v1858_v8 = vld [vmem:[%s2841_s1 + $0x7c] ss:$12 sps:$4 sm:$0xff]   ;;  %v1862_v10 = vld [vmem:[%s2841_s1 + $0x78] ss:$12 sps:$4 sm:$0xff]  }
   0x4   :  { %1071 = vmatpush1.bf16.msra.mxu1 %v1851_v3  ;;  %v1854_v5 = vld [vmem:[%s2841_s1 + $0x214] ss:$12 sps:$4 sm:$0xff]   ;;  %1019 = vmatprep.subr.bf16.mxu0 %v1852_v4  ;;  %v1860_v9 = vld [vmem:[%s2841_s1 + $0x1fc] ss:$12 sps:$4 sm:$0xff]   ;;  %v1863_v11 = vld [vmem:[%s2841_s1 + $0x1f8] ss:$12 sps:$4 sm:$0xff]  }
   0x5   :  { %1072 = vmatprep.subr.bf16.mxu1 %v1854_v5  ;;  %v1864_v12 = vld [vmem:[%s2841_s1 + $0x64] ss:$12 sps:$4 sm:$0xff]   ;;  %v1868_v14 = vld [vmem:[%s2841_s1 + $0x60] ss:$12 sps:$4 sm:$0xff]   ;;  %v1874_v18 = vld [vmem:[%s2841_s1 + $0x48] ss:$12 sps:$4 sm:$0xff]  }
   0x6   :  { %v1866_v13 = vld [vmem:[%s2841_s1 + $0x1e4] ss:$12 sps:$4 sm:$0xff]   ;;  %v1869_v15 = vld [vmem:[%s2841_s1 + $0x1e0] ss:$12 sps:$4 sm:$0xff]   ;;  %v1875_v19 = vld [vmem:[%s2841_s1 + $0x1c8] ss:$12 sps:$4 sm:$0xff]  }
   0x7   :  { %1020 = vmatpush1.bf16.msra.mxu0 %v1856_v6  ;;  %v1870_v16 = vld [vmem:[%s2841_s1 + $0x4c] ss:$12 sps:$4 sm:$0xff]   ;;  %v1876_v20 = vld [vmem:[%s2841_s1 + $0x34] ss:$12 sps:$4 sm:$0xff]   ;;  %v1880_v22 = vld [vmem:[%s2841_s1 + $0x30] ss:$12 sps:$4 sm:$0xff]  }
   0x8   :  { %1073 = vmatpush1.bf16.msra.mxu1 %v1857_v7  ;;  %1021 = vmatprep.subr.bf16.mxu0 %v1858_v8  ;;  %v1872_v17 = vld [vmem:[%s2841_s1 + $0x1cc] ss:$12 sps:$4 sm:$0xff]   ;;  %v1878_v21 = vld [vmem:[%s2841_s1 + $0x1b4] ss:$12 sps:$4 sm:$0xff]   ;;  %v1881_v23 = vld [vmem:[%s2841_s1 + $0x1b0] ss:$12 sps:$4 sm:$0xff]  }
   0x9   :  { %1074 = vmatprep.subr.bf16.mxu1 %v1860_v9  ;;  %v1882_v24 = vld [vmem:[%s2841_s1 + $0x1c] ss:$12 sps:$4 sm:$0xff]   ;;  %v1886_v26 = vld [vmem:[%s2841_s1 + $0x18] ss:$12 sps:$4 sm:$0xff]   ;;  %v1892_v30 = vld [vmem:[%s2841_s1] ss:$12 sps:$4 sm:$0xff]  }
   0xa   :  { %v1884_v25 = vld [vmem:[%s2841_s1 + $0x19c] ss:$12 sps:$4 sm:$0xff]   ;;  %v1887_v27 = vld [vmem:[%s2841_s1 + $0x198] ss:$12 sps:$4 sm:$0xff]   ;;  %v1893_v31 = vld [vmem:[%s2841_s1 + $0x180] ss:$12 sps:$4 sm:$0xff]  }
   0xb   :  { %1022 = vmatpush1.bf16.msra.mxu0 %v1862_v10  ;;  %v1888_v28 = vld [vmem:[%s2841_s1 + $0x4] ss:$12 sps:$4 sm:$0xff]   ;;  %v1894_v32 = vld [vmem:[%s2841_s1 + $0x16c] ss:$12 sps:$4 sm:$0xff]   ;;  %v1898_v34 = vld [vmem:[%s2841_s1 + $0x168] ss:$12 sps:$4 sm:$0xff]  }
   0xc   :  { %1075 = vmatpush1.bf16.msra.mxu1 %v1863_v11  ;;  %1023 = vmatprep.subr.bf16.mxu0 %v1864_v12  ;;  %v1890_v29 = vld [vmem:[%s2841_s1 + $0x184] ss:$12 sps:$4 sm:$0xff]   ;;  %v1896_v33 = vld [vmem:[%s2841_s1 + $0x2ec] ss:$12 sps:$4 sm:$0xff]   ;;  %v1899_v35 = vld [vmem:[%s2841_s1 + $0x2e8] ss:$12 sps:$4 sm:$0xff]  }
   0xd   :  { %1076 = vmatprep.subr.bf16.mxu1 %v1866_v13  ;;  %v1900_v36 = vld [vmem:[%s2841_s1 + $0x154] ss:$12 sps:$4 sm:$0xff]   ;;  %v1904_v38 = vld [vmem:[%s2841_s1 + $0x150] ss:$12 sps:$4 sm:$0xff]   ;;  %v1910_v42 = vld [vmem:[%s2841_s1 + $0x138] ss:$12 sps:$4 sm:$0xff]  }
   0xe   :  { %v1902_v37 = vld [vmem:[%s2841_s1 + $0x2d4] ss:$12 sps:$4 sm:$0xff]   ;;  %v1905_v39 = vld [vmem:[%s2841_s1 + $0x2d0] ss:$12 sps:$4 sm:$0xff]   ;;  %v1911_v43 = vld [vmem:[%s2841_s1 + $0x2b8] ss:$12 sps:$4 sm:$0xff]  }
   0xf   :  { %1024 = vmatpush1.bf16.msra.mxu0 %v1868_v14  ;;  %v1906_v40 = vld [vmem:[%s2841_s1 + $0x13c] ss:$12 sps:$4 sm:$0xff]   ;;  %v1912_v44 = vld [vmem:[%s2841_s1 + $0x124] ss:$12 sps:$4 sm:$0xff]   ;;  %v1916_v50 = vld [vmem:[%s2841_s1 + $0x120] ss:$12 sps:$4 sm:$0xff]  }
  0x10   :  { %1077 = vmatpush1.bf16.msra.mxu1 %v1869_v15  ;;  %1025 = vmatprep.subr.bf16.mxu0 %v1870_v16  ;;  %v1908_v41 = vld [vmem:[%s2841_s1 + $0x2bc] ss:$12 sps:$4 sm:$0xff]   ;;  %v1914_v45 = vld [vmem:[%s2841_s1 + $0x2a4] ss:$12 sps:$4 sm:$0xff]   ;;  %v1917_v51 = vld [vmem:[%s2841_s1 + $0x2a0] ss:$12 sps:$4 sm:$0xff]  }
  0x11   :  { %1078 = vmatprep.subr.bf16.mxu1 %v1872_v17  ;;  %v22_v46 = vld [vmem:[%s2842_s0 + $0x8] sm:$0xff]  ;;  %v28_v47 = vld [vmem:[%s2842_s0 + $0x38] sm:$0xff]  ;;  %v1924_v58 = vld [vmem:[%s2841_s1 + $0xf4] ss:$12 sps:$4 sm:$0xff]   ;;  %vm1396_vm6 = vcmask 522240   ;;  %vm1425_vm7 = vcmask 1046016  }
  0x12   :  { %v24_v48 = vld [vmem:[%s2842_s0 + $0x18] sm:$0xff]  ;;  %v30_v49 = vld [vmem:[%s2842_s0 + $0x48] sm:$0xff]  ;;  %v2229_v53 = vpack.c.bf16 %v28_v47, %v22_v46  ;;  %v1926_v59 = vld [vmem:[%s2841_s1 + $0x274] ss:$12 sps:$4 sm:$0xff]   ;;  %vm1487_vm8 = vcmask 523264  }
  0x13   :  { %1026 = vmatpush1.bf16.msra.mxu0 %v1874_v18  ;;  %v1918_v52 = vld [vmem:[%s2841_s1 + $0x10c] ss:$12 sps:$4 sm:$0xff]   ;;  %v2231_v54 = vpack.c.bf16 %v30_v49, %v24_v48  ;;  %v1922_v56 = vld [vmem:[%s2841_s1 + $0x108] ss:$12 sps:$4 sm:$0xff]   ;;  %v1928_v60 = vld [vmem:[%s2841_s1 + $0xf0] ss:$12 sps:$4 sm:$0xff]  }
  0x14   :  { %1079 = vmatpush1.bf16.msra.mxu1 %v1875_v19  ;;  %1027 = vmatprep.subr.bf16.mxu0 %v1876_v20  ;;  %v1920_v55 = vld [vmem:[%s2841_s1 + $0x28c] ss:$12 sps:$4 sm:$0xff]   ;;  %v1923_v57 = vld [vmem:[%s2841_s1 + $0x288] ss:$12 sps:$4 sm:$0xff]   ;;  %v1929_v61 = vld [vmem:[%s2841_s1 + $0x270] ss:$12 sps:$4 sm:$0xff]  }
  0x15   :  { %1080 = vmatprep.subr.bf16.mxu1 %v1878_v21  ;;  %1049 = vmatprep.mubr.bf16.mxu0 %v2229_v53  ;;  %v1930_v62 = vld [vmem:[%s2841_s1 + $0xdc] ss:$12 sps:$4 sm:$0xff]   ;;  %v1934_v0 = vld [vmem:[%s2841_s1 + $0xd8] ss:$12 sps:$4 sm:$0xff]   ;;  %v1940_v4 = vld [vmem:[%s2841_s1 + $0xc0] ss:$12 sps:$4 sm:$0xff]  }
  0x16   :  { %1102 = vmatprep.mubr.bf16.mxu1 %v2231_v54  ;;  %v1932_v63 = vld [vmem:[%s2841_s1 + $0x25c] ss:$12 sps:$4 sm:$0xff]   ;;  %v1935_v1 = vld [vmem:[%s2841_s1 + $0x258] ss:$12 sps:$4 sm:$0xff]   ;;  %v1941_v5 = vld [vmem:[%s2841_s1 + $0x240] ss:$12 sps:$4 sm:$0xff]  }
  0x17   :  { %1028 = vmatpush1.bf16.msra.mxu0 %v1880_v22  ;;  %v1936_v2 = vld [vmem:[%s2841_s1 + $0xc4] ss:$12 sps:$4 sm:$0xff]   ;;  %v1944_v10 = vld [vmem:[%s2841_s1 + $0x3ac] ss:$12 sps:$4 sm:$0xff]   ;;  %v1942_v14 = vld [vmem:[%s2841_s1 + $0x3a8] ss:$12 sps:$4 sm:$0xff]  }
  0x18   :  { %1081 = vmatpush1.bf16.msra.mxu1 %v1881_v23  ;;  %1029 = vmatprep.subr.bf16.mxu0 %v1882_v24  ;;  %v1938_v3 = vld [vmem:[%s2841_s1 + $0x244] ss:$12 sps:$4 sm:$0xff]   ;;  %v1947_v16 = vld [vmem:[%s2841_s1 + $0x394] ss:$12 sps:$4 sm:$0xff]   ;;  %v1950_v19 = vld [vmem:[%s2841_s1 + $0x37c] ss:$12 sps:$4 sm:$0xff]  }
  0x19   :  { %1082 = vmatprep.subr.bf16.mxu1 %v1884_v25  ;;  %v21_v6 = vld [vmem:[%s2842_s0] sm:$0xff]  ;;  %v27_v7 = vld [vmem:[%s2842_s0 + $0x30] sm:$0xff]  ;;  %v1962_v47 = vld [vmem:[%s2841_s1 + $0x31c] ss:$12 sps:$4 sm:$0xff]  }
  0x1a   :  { %v23_v8 = vld [vmem:[%s2842_s0 + $0x10] sm:$0xff]  ;;  %v29_v9 = vld [vmem:[%s2842_s0 + $0x40] sm:$0xff]  ;;  %v2298_v12 = vpack.c.bf16 %v27_v7, %v21_v6 }
  0x1b   :  { %1030 = vmatpush1.bf16.msra.mxu0 %v1886_v26  ;;  %v1966_v11 = vld [vmem:[%s2841_s1 + $0x170] ss:$12 sps:$4 sm:$0xff]   ;;  %v2300_v13 = vpack.c.bf16 %v29_v9, %v23_v8  ;;  %v1971_v17 = vld [vmem:[%s2841_s1 + $0x158] ss:$12 sps:$4 sm:$0xff]   ;;  %v1976_v21 = vld [vmem:[%s2841_s1 + $0x140] ss:$12 sps:$4 sm:$0xff]  }
  0x1c   :  { %1083 = vmatpush1.bf16.msra.mxu1 %v1887_v27  ;;  %1031 = vmatprep.subr.bf16.mxu0 %v1888_v28  ;;  %v1967_v15 = vld [vmem:[%s2841_s1 + $0xb0] ss:$12 sps:$4 sm:$0xff]   ;;  %v1972_v20 = vld [vmem:[%s2841_s1 + $0x98] ss:$12 sps:$4 sm:$0xff]   ;;  %v1977_v24 = vld [vmem:[%s2841_s1 + $0x80] ss:$12 sps:$4 sm:$0xff]  }
  0x1d   :  { %1084 = vmatprep.subr.bf16.mxu1 %v1890_v29  ;;  %v1945_v18 = vld [vmem:[%s2841_s1 + $0x390] ss:$12 sps:$4 sm:$0xff]   ;;  %v1948_v22 = vld [vmem:[%s2841_s1 + $0x378] ss:$12 sps:$4 sm:$0xff]   ;;  %v1981_v25 = vld [vmem:[%s2841_s1 + $0x128] ss:$12 sps:$4 sm:$0xff]  }
  0x1e   :  { %v1953_v23 = vld [vmem:[%s2841_s1 + $0x364] ss:$12 sps:$4 sm:$0xff]   ;;  %v34_v26 = vld [vmem:[%s2842_s0 + $0x68] sm:$0xff]  ;;  %v40_v27 = vld [vmem:[%s2842_s0 + $0x98] sm:$0xff] }
  0x1f   :  { %1032 = vmatpush1.bf16.msra.mxu0 %v1892_v30  ;;  %v36_v28 = vld [vmem:[%s2842_s0 + $0x78] sm:$0xff]  ;;  %v42_v29 = vld [vmem:[%s2842_s0 + $0xa8] sm:$0xff]  ;;  %v1985_v7 = vld [vmem:[%s2841_s1 + $0x424] ss:$12 sps:$4 sm:$0xff]  }
  0x20   :  { %1085 = vmatpush1.bf16.msra.mxu1 %v1893_v31  ;;  %1033 = vmatprep.subr.bf16.mxu0 %v1894_v32  ;;  %v1951_v30 = vld [vmem:[%s2841_s1 + $0x360] ss:$12 sps:$4 sm:$0xff]   ;;  %v2355_v31 = vpack.c.bf16 %v40_v27, %v34_v26  ;;  %v2357_v32 = vpack.c.bf16 %v42_v29, %v36_v28  ;;  %v1957_v46 = vld [vmem:[%s2841_s1 + $0x330] ss:$12 sps:$4 sm:$0xff]   ;;  %v1992_v48 = vld [vmem:[%s2841_s1 + $0x38] ss:$12 sps:$4 sm:$0xff]  }
  0x21   :  { %1086 = vmatprep.subr.bf16.mxu1 %v1896_v33  ;;  %v33_v33 = vld [vmem:[%s2842_s0 + $0x60] sm:$0xff]  ;;  %v2018_v9 = vld [vmem:[%s2841_s1 + $0x2a8] ss:$12 sps:$4 sm:$0xff]  }
  0x22   :  { %v1996_v49 = vld [vmem:[%s2841_s1 + $0xe0] ss:$12 sps:$4 sm:$0xff]   ;;  %v1978_v6 = vld [vmem:[%s2841_s1 + $0x438] ss:$12 sps:$4 sm:$0xff]   ;;  %v31_v28 = vld [vmem:[%s2842_s0 + $0x50] sm:$0xff] }
  0x23   :  { %1034 = vmatpush2.bf16.msra.mxu0 %v1898_v34  ;;  %v39_v34 = vld [vmem:[%s2842_s0 + $0x90] sm:$0xff]  ;;  %v2015_v8 = vld [vmem:[%s2841_s1 + $0x200] ss:$12 sps:$4 sm:$0xff]  }
  0x24   :  { %1087 = vmatpush2.bf16.msra.mxu1 %v1899_v35  ;;  %1035 = vmatprep.subr.bf16.mxu0 %v1900_v36  ;;  %v35_v35 = vld [vmem:[%s2842_s0 + $0x70] sm:$0xff]  ;;  %v1956_v36 = vld [vmem:[%s2841_s1 + $0x34c] ss:$12 sps:$4 sm:$0xff]   ;;  %v25_v27 = vld [vmem:[%s2842_s0 + $0x20] sm:$0xff] }
  0x25   :  { %1088 = vmatprep.subr.bf16.mxu1 %v1902_v37  ;;  %v2371_v37 = vpack.c.bf16 %v39_v34, %v33_v33  ;;  %v2003_v26 = vld [vmem:[%s2841_s1 + $0x3c0] ss:$12 sps:$4 sm:$0xff]   ;;  %v2035_v29 = vld [vmem:[%s2841_s1 + $0x188] ss:$12 sps:$4 sm:$0xff]   ;;  %v44_v33 = vld [vmem:[%s2842_s0 + $0xb8] sm:$0xff]  ;;  %v49_v34 = vpack.c.bf16 %v31_v28, %v25_v27 }
  0x27   :  { %1036 = vmatpush2.bf16.msra.mxu0 %v1904_v38  ;;  %v41_v38 = vld [vmem:[%s2842_s0 + $0xa0] sm:$0xff] }
  0x28   :  { %1089 = vmatpush2.bf16.msra.mxu1 %v1905_v39  ;;  %1037 = vmatprep.subr.bf16.mxu0 %v1906_v40  ;;  %v1982_v39 = vld [vmem:[%s2841_s1 + $0x68] ss:$12 sps:$4 sm:$0xff]   ;;  %v2379_v40 = vpack.c.bf16 %v41_v38, %v35_v35  ;;  %v2009_v35 = vld [vmem:[%s2841_s1 + $0x3b0] ss:$12 sps:$4 sm:$0xff]   ;;  %v2013_v38 = vld [vmem:[%s2841_s1 + $0x398] ss:$12 sps:$4 sm:$0xff]  }
  0x29   :  { %1090 = vmatprep.subr.bf16.mxu1 %v1908_v41  ;;  %v1986_v41 = vld [vmem:[%s2841_s1 + $0x110] ss:$12 sps:$4 sm:$0xff]  }
  0x2b   :  { %1038 = vmatpush2.bf16.msra.mxu0 %v1910_v42  ;;  %v1954_v42 = vld [vmem:[%s2841_s1 + $0x348] ss:$12 sps:$4 sm:$0xff]  }
  0x2c   :  { %1091 = vmatpush2.bf16.msra.mxu1 %v1911_v43  ;;  %1039 = vmatprep.subr.bf16.mxu0 %v1912_v44  ;;  %v1987_v43 = vld [vmem:[%s2841_s1 + $0x50] ss:$12 sps:$4 sm:$0xff]   ;;  %v1959_v44 = vld [vmem:[%s2841_s1 + $0x334] ss:$12 sps:$4 sm:$0xff]  }
  0x2d   :  { %1092 = vmatprep.subr.bf16.mxu1 %v1914_v45  ;;  %v1991_v45 = vld [vmem:[%s2841_s1 + $0xf8] ss:$12 sps:$4 sm:$0xff]  }
  0x2f   :  { %1040 = vmatpush2.bf16.msra.mxu0 %v1916_v50  ;;  %v26_v50 = vld [vmem:[%s2842_s0 + $0x28] sm:$0xff] }
  0x30   :  { %1093 = vmatpush2.bf16.msra.mxu1 %v1917_v51  ;;  %1041 = vmatprep.subr.bf16.mxu0 %v1918_v52  ;;  %v32_v51 = vld [vmem:[%s2842_s0 + $0x58] sm:$0xff] }
  0x31   :  { %1094 = vmatprep.subr.bf16.mxu1 %v1920_v55  ;;  %v1960_v52 = vld [vmem:[%s2841_s1 + $0x318] ss:$12 sps:$4 sm:$0xff]  }
  0x32   :  { %v1965_v55 = vld [vmem:[%s2841_s1 + $0x304] ss:$12 sps:$4 sm:$0xff]  }
  0x33   :  { %1042 = vmatpush2.bf16.msra.mxu0 %v1922_v56  ;;  %v1997_v56 = vld [vmem:[%s2841_s1 + $0x20] ss:$12 sps:$4 sm:$0xff]  }
  0x34   :  { %1095 = vmatpush2.bf16.msra.mxu1 %v1923_v57  ;;  %1043 = vmatprep.subr.bf16.mxu0 %v1924_v58  ;;  %v2001_v57 = vld [vmem:[%s2841_s1 + $0xc8] ss:$12 sps:$4 sm:$0xff]   ;;  %v1963_v58 = vld [vmem:[%s2841_s1 + $0x300] ss:$12 sps:$4 sm:$0xff]  }
  0x35   :  { %1096 = vmatprep.subr.bf16.mxu1 %v1926_v59  ;;  %v1970_v59 = vld [vmem:[%s2841_s1 + $0x46c] ss:$12 sps:$4 sm:$0xff]  }
  0x37   :  { %1044 = vmatpush2.bf16.msra.mxu0 %v1928_v60  ;;  %v2002_v60 = vld [vmem:[%s2841_s1 + $0x8] ss:$12 sps:$4 sm:$0xff]  }
  0x38   :  { %1097 = vmatpush2.bf16.msra.mxu1 %v1929_v61  ;;  %1045 = vmatprep.subr.bf16.mxu0 %v1930_v62  ;;  %v2006_v61 = vld [vmem:[%s2841_s1 + $0x2f0] ss:$12 sps:$4 sm:$0xff]   ;;  %v1968_v62 = vld [vmem:[%s2841_s1 + $0x468] ss:$12 sps:$4 sm:$0xff]  }
  0x39   :  { %1098 = vmatprep.subr.bf16.mxu1 %v1932_v63  ;;  %v2007_v63 = vld [vmem:[%s2841_s1 + $0x230] ss:$12 sps:$4 sm:$0xff]  }
  0x3b   :  { %1046 = vmatpush2.bf16.msra.mxu0 %v1934_v0  ;;  %v1975_v0 = vld [vmem:[%s2841_s1 + $0x454] ss:$12 sps:$4 sm:$0xff]  }
  0x3c   :  { %1099 = vmatpush2.bf16.msra.mxu1 %v1935_v1  ;;  %1047 = vmatprep.subr.bf16.mxu0 %v1936_v2  ;;  %v2010_v1 = vld [vmem:[%s2841_s1 + $0x2d8] ss:$12 sps:$4 sm:$0xff]   ;;  %v1973_v2 = vld [vmem:[%s2841_s1 + $0x450] ss:$12 sps:$4 sm:$0xff]  }
  0x3d   :  { %1100 = vmatprep.subr.bf16.mxu1 %v1938_v3  ;;  %v1980_v3 = vld [vmem:[%s2841_s1 + $0x43c] ss:$12 sps:$4 sm:$0xff]  }
  0x3f   :  { %1048 = vmatpush2.bf16.msra.mxu0 %v1940_v4  ;;  %v2011_v4 = vld [vmem:[%s2841_s1 + $0x218] ss:$12 sps:$4 sm:$0xff]  }
  0x40   :  { %1101 = vmatpush2.bf16.msra.mxu1 %v1941_v5  ;;  %1123 = vmatprep.subr.bf16.mxu0 %v1944_v10  ;;  %v2014_v5 = vld [vmem:[%s2841_s1 + $0x2c0] ss:$12 sps:$4 sm:$0xff]  }
  0x41   :  { %1760 = vmatprep.subr.bf16.mxu1 %v1966_v11  ;;  %v1983_v10 = vld [vmem:[%s2841_s1 + $0x420] ss:$12 sps:$4 sm:$0xff]  }
  0x42   :  { %1050 = vmatmul.mubr.bf16.vlgmr.msra.gmra.mxu0 %v2298_v12  ;;  %v1990_v11 = vld [vmem:[%s2841_s1 + $0x40c] ss:$12 sps:$4 sm:$0xff]  }
  0x43   :  { %1103 = vmatmul.mubr.bf16.vlgmr.msra.gmra.mxu1 %v2300_v13  ;;  %1124 = vmatpush1.bf16.msra.mxu0 %v1942_v14  ;;  %v2022_v14 = vld [vmem:[%s2841_s1 + $0x290] ss:$12 sps:$4 sm:$0xff]  }
  0x44   :  { %1761 = vmatpush3.bf16.msra.mxu1 %v1967_v15  ;;  %1125 = vmatprep.subr.bf16.mxu0 %v1947_v16  ;;  %v1988_v15 = vld [vmem:[%s2841_s1 + $0x408] ss:$12 sps:$4 sm:$0xff]  }
  0x45   :  { %1762 = vmatprep.subr.bf16.mxu1 %v1971_v17  ;;  %1059 = vmatprep.mubr.bf16.mxu0 %v2355_v31  ;;  %v1995_v16 = vld [vmem:[%s2841_s1 + $0x3f4] ss:$12 sps:$4 sm:$0xff]   ;;  %v2023_v17 = vld [vmem:[%s2841_s1 + $0x1d0] ss:$12 sps:$4 sm:$0xff]  }
  0x46   :  { %1112 = vmatprep.mubr.bf16.mxu1 %v2357_v32 }
  0x47   :  { %1126 = vmatpush1.bf16.msra.mxu0 %v1945_v18  ;;  %v2026_v18 = vld [vmem:[%s2841_s1 + $0x278] ss:$12 sps:$4 sm:$0xff]  }
  0x48   :  { %1763 = vmatpush3.bf16.msra.mxu1 %v1972_v20  ;;  %1127 = vmatprep.subr.bf16.mxu0 %v1950_v19  ;;  %v2000_v19 = vld [vmem:[%s2841_s1 + $0x3dc] ss:$12 sps:$4 sm:$0xff]   ;;  %v2027_v20 = vld [vmem:[%s2841_s1 + $0x1b8] ss:$12 sps:$4 sm:$0xff]  }
  0x49   :  { %1764 = vmatprep.subr.bf16.mxu1 %v1976_v21  ;;  %v2030_v21 = vld [vmem:[%s2841_s1 + $0x260] ss:$12 sps:$4 sm:$0xff]  }
  0x4a   :  { %1060 = vmatmul.mubr.bf16.gmra.mxu0 %v2371_v37 }
  0x4b   :  { %1128 = vmatpush1.bf16.msra.mxu0 %v1948_v22  ;;  %1113 = vmatmul.mubr.bf16.gmra.mxu1 %v2379_v40  ;;  %v1998_v22 = vld [vmem:[%s2841_s1 + $0x3d8] ss:$12 sps:$4 sm:$0xff]  }
  0x4c   :  { %1765 = vmatpush3.bf16.msra.mxu1 %v1977_v24  ;;  %1129 = vmatprep.subr.bf16.mxu0 %v1953_v23  ;;  %v2031_v23 = vld [vmem:[%s2841_s1 + $0x1a0] ss:$12 sps:$4 sm:$0xff]   ;;  %v2005_v24 = vld [vmem:[%s2841_s1 + $0x3c4] ss:$12 sps:$4 sm:$0xff]  }
  0x4d   :  { %1766 = vmatprep.subr.bf16.mxu1 %v1981_v25  ;;  %1208 = vmatprep.mubr.bf16.mxu1 %v2229_v53  ;;  %v2422_v53 = vpack.c.bf16 %v32_v51, %v26_v50  ;;  %v2034_v25 = vld [vmem:[%s2841_s1 + $0x248] ss:$12 sps:$4 sm:$0xff]  }
  0x4e   :  { %v2036_v50 = vld [vmem:[%s2841_s1 + $0x3c8] ss:$12 sps:$4 sm:$0xff]  }
  0x4f   :  { %1130 = vmatpush1.bf16.msra.mxu0 %v1951_v30  ;;  %1155 = vmatprep.mubr.bf16.mxu0 %v2422_v53  ;;  %v2008_v30 = vld [vmem:[%s2841_s1 + $0x470] ss:$12 sps:$4 sm:$0xff]   ;;  %v2037_v51 = vld [vmem:[%s2841_s1 + $0x308] ss:$12 sps:$4 sm:$0xff]  }
  0x50   :  { %1767 = vmatpush3.bf16.msra.mxu1 %v1982_v39  ;;  %1131 = vmatprep.subr.bf16.mxu0 %v1956_v36  ;;  %v37_v39 = vld [vmem:[%s2842_s0 + $0x80] sm:$0xff] }
  0x51   :  { %1768 = vmatprep.subr.bf16.mxu1 %v1986_v41  ;;  %v43_v41 = vld [vmem:[%s2842_s0 + $0xb0] sm:$0xff] }
  0x53   :  { %1132 = vmatpush1.bf16.msra.mxu0 %v1954_v42  ;;  %v2016_v42 = vld [vmem:[%s2841_s1 + $0x440] ss:$12 sps:$4 sm:$0xff]  }
  0x54   :  { %1769 = vmatpush3.bf16.msra.mxu1 %v1987_v43  ;;  %1133 = vmatprep.subr.bf16.mxu0 %v1959_v44  ;;  %v2017_v43 = vld [vmem:[%s2841_s1 + $0x380] ss:$12 sps:$4 sm:$0xff]   ;;  %v2020_v44 = vld [vmem:[%s2841_s1 + $0x428] ss:$12 sps:$4 sm:$0xff]  }
  0x55   :  { %1770 = vmatprep.subr.bf16.mxu1 %v1991_v45  ;;  %v2021_v45 = vld [vmem:[%s2841_s1 + $0x368] ss:$12 sps:$4 sm:$0xff]  }
  0x57   :  { %1134 = vmatpush1.bf16.msra.mxu0 %v1957_v46  ;;  %v2025_v46 = vld [vmem:[%s2841_s1 + $0x350] ss:$12 sps:$4 sm:$0xff]  }
  0x58   :  { %1771 = vmatpush3.bf16.msra.mxu1 %v1992_v48  ;;  %1135 = vmatprep.subr.bf16.mxu0 %v1962_v47  ;;  %v2029_v47 = vld [vmem:[%s2841_s1 + $0x338] ss:$12 sps:$4 sm:$0xff]   ;;  %v2032_v48 = vld [vmem:[%s2841_s1 + $0x3e0] ss:$12 sps:$4 sm:$0xff]  }
  0x59   :  { %1772 = vmatprep.subr.bf16.mxu1 %v1996_v49  ;;  %v2033_v49 = vld [vmem:[%s2841_s1 + $0x320] ss:$12 sps:$4 sm:$0xff]  }
  0x5b   :  { %1136 = vmatpush1.bf16.msra.mxu0 %v1960_v52 }
  0x5c   :  { %1773 = vmatpush3.bf16.msra.mxu1 %v1997_v56  ;;  %1137 = vmatprep.subr.bf16.mxu0 %v1965_v55 }
  0x5d   :  { %1774 = vmatprep.subr.bf16.mxu1 %v2001_v57 }
  0x5f   :  { %1138 = vmatpush1.bf16.msra.mxu0 %v1963_v58 }
  0x60   :  { %1775 = vmatpush3.bf16.msra.mxu1 %v2002_v60  ;;  %1139 = vmatprep.subr.bf16.mxu0 %v1970_v59 }
  0x61   :  { %1788 = vmatprep.subr.bf16.mxu1 %v2006_v61 }
  0x63   :  { %1209 = vmatmul.mubr.bf16.vlgmr.msra.gmra.mxu1 %v2298_v12  ;;  %1140 = vmatpush2.bf16.msra.mxu0 %v1968_v62  ;;  %v2019_v12 = vld [vmem:[%s2841_s1 + $0x1e8] ss:$12 sps:$4 sm:$0xff]  }
  0x64   :  { %1789 = vmatpush3.bf16.msra.mxu1 %v2007_v63  ;;  %1141 = vmatprep.subr.bf16.mxu0 %v1975_v0 }
  0x65   :  { %1790 = vmatprep.subr.bf16.mxu1 %v2010_v1  ;;  %1216 = vmatprep.mubr.bf16.mxu1 %v2355_v31  ;;  %v38_v31 = vld [vmem:[%s2842_s0 + $0x88] sm:$0xff] }
  0x66   :  { %v56_v36 = vpack.c.bf16 %v44_v33, %v38_v31 }
  0x67   :  { %1142 = vmatpush2.bf16.msra.mxu0 %v1973_v2 }
  0x68   :  { %1791 = vmatpush3.bf16.msra.mxu1 %v2011_v4  ;;  %1143 = vmatprep.subr.bf16.mxu0 %v1980_v3 }
  0x69   :  { %1792 = vmatprep.subr.bf16.mxu1 %v2014_v5 }
  0x6b   :  { %1217 = vmatmul.mubr.bf16.gmra.mxu1 %v2371_v37  ;;  %1144 = vmatpush2.bf16.msra.mxu0 %v1978_v6  ;;  %v2012_v37 = vld [vmem:[%s2841_s1 + $0x458] ss:$12 sps:$4 sm:$0xff]  }
  0x6c   :  { %1793 = vmatpush3.bf16.msra.mxu1 %v2015_v8  ;;  %1145 = vmatprep.subr.bf16.mxu0 %v1985_v7 }
  0x6d   :  { %1794 = vmatprep.subr.bf16.mxu1 %v2018_v9  ;;  %1257 = vmatprep.mubr.bf16.mxu1 %v2231_v54  ;;  %v1993_v54 = vld [vmem:[%s2841_s1 + $0x3f0] ss:$12 sps:$4 sm:$0xff]  }
  0x6f   :  { %1146 = vmatpush2.bf16.msra.mxu0 %v1983_v10 }
  0x70   :  { %1795 = vmatpush3.bf16.msra.mxu1 %v2019_v12  ;;  %1147 = vmatprep.subr.bf16.mxu0 %v1990_v11 }
  0x71   :  { %1796 = vmatprep.subr.bf16.mxu1 %v2022_v14 }
  0x73   :  { %1148 = vmatpush2.bf16.msra.mxu0 %v1988_v15  ;;  %v1327_v15 = vlaneseq }
  0x74   :  { %1797 = vmatpush3.bf16.msra.mxu1 %v2023_v17  ;;  %1149 = vmatprep.subr.bf16.mxu0 %v1995_v16 }
  0x75   :  { %1798 = vmatprep.subr.bf16.mxu1 %v2026_v18 }
  0x77   :  { %1150 = vmatpush2.bf16.msra.mxu0 %v1993_v54 }
  0x78   :  { %1799 = vmatpush3.bf16.msra.mxu1 %v2027_v20  ;;  %1151 = vmatprep.subr.bf16.mxu0 %v2000_v19 }
  0x79   :  { %1800 = vmatprep.subr.bf16.mxu1 %v2030_v21 }
  0x7b   :  { %1152 = vmatpush2.bf16.msra.mxu0 %v1998_v22  ;;  %v2645_v22 = vshrl.u32 %v1327_v15, 7 }
  0x7c   :  { %1801 = vmatpush3.bf16.msra.mxu1 %v2031_v23  ;;  %1153 = vmatprep.subr.bf16.mxu0 %v2005_v24 }
  0x7d   :  { %1802 = vmatprep.subr.bf16.mxu1 %v2034_v25  ;;  %vm1338_vm1 = vcmp.lt.s32.totalorder %v2645_v22, 6  ;;  %vm1329_vm5 = vcmp.lt.s32.totalorder %v2645_v22, 7 }
  0x7f   :  { %1154 = vmatpush2.bf16.msra.mxu0 %v2003_v26 }
  0x80   :  { %1803 = vmatpush3.bf16.msra.mxu1 %v2035_v29  ;;  %1816 = vmatprep.subr.bf16.mxu0 %v2008_v30 }
  0x82   :  { %1156 = vmatmul.mubr.bf16.vlgmr.msra.gmra.mxu0 %v49_v34 }
  0x83   :  { %1258 = vmatmul.mubr.bf16.vlgmr.msra.gmra.mxu1 %v2300_v13  ;;  %1817 = vmatpush3.bf16.msra.mxu0 %v2009_v35  ;;  %v55_v13 = vpack.c.bf16 %v43_v41, %v37_v39 }
  0x84   :  { %1165 = vmatprep.mubr.bf16.mxu0 %v56_v36  ;;  %1818 = vmatprep.subr.bf16.mxu0 %v2012_v37 }
  0x85   :  { %1265 = vmatprep.mubr.bf16.mxu1 %v2357_v32  ;;  %v2024_v32 = vld [vmem:[%s2841_s1 + $0x410] ss:$12 sps:$4 sm:$0xff]  }
  0x87   :  { %1819 = vmatpush3.bf16.msra.mxu0 %v2013_v38 }
  0x88   :  { %1820 = vmatprep.subr.bf16.mxu0 %v2016_v42 }
  0x8a   :  { %1166 = vmatmul.mubr.bf16.gmra.mxu0 %v55_v13 }
  0x8b   :  { %1266 = vmatmul.mubr.bf16.gmra.mxu1 %v2379_v40  ;;  %1821 = vmatpush3.bf16.msra.mxu0 %v2017_v43  ;;  %v2028_v40 = vld [vmem:[%s2841_s1 + $0x3f8] ss:$12 sps:$4 sm:$0xff]   ;;  %s2038_s1 = smov 64  }
  0x8c   :  { %1306 = vmatprep.mubr.bf16.mxu0 %v2422_v53  ;;  %1822 = vmatprep.subr.bf16.mxu0 %v2020_v44 }
  0x8f   :  { %1823 = vmatpush3.bf16.msra.mxu0 %v2021_v45 }
  0x90   :  { %1824 = vmatprep.subr.bf16.mxu0 %v2024_v32 }
  0x93   :  { %1825 = vmatpush3.bf16.msra.mxu0 %v2025_v46 }
  0x94   :  { %1826 = vmatprep.subr.bf16.mxu0 %v2028_v40 }
  0x97   :  { %1827 = vmatpush3.bf16.msra.mxu0 %v2029_v47 }
  0x98   :  { %1828 = vmatprep.subr.bf16.mxu0 %v2032_v48 }
  0x9b   :  { %1829 = vmatpush3.bf16.msra.mxu0 %v2033_v49 }
  0x9c   :  { %1830 = vmatprep.subr.bf16.mxu0 %v2036_v50 }
  0x9f   :  { %1831 = vmatpush3.bf16.msra.mxu0 %v2037_v51 }
  0xa2   :  { %1307 = vmatmul.mubr.bf16.vlgmr.msra.gmra.mxu0 %v49_v34 }
  0xa3   :  { %1314 = vmatprep.mubr.bf16.mxu0 %v56_v36 }
  0xaa   :  { %1315 = vmatmul.mubr.bf16.gmra.mxu0 %v55_v13 }
 0x102   :  { %v2616_v59 = vpop.f32.mrf.mxu0 }
 0x103   :  { %v2610_v52 = vpop.f32.mrf.mxu1 }
 0x104   :  { %v1053_v61 = vpop.f32.mrf.mxu0 }
 0x105   :  { %v1106_v53 = vpop.f32.mrf.mxu1 }
 0x106   :  { %v2622_v0 = vpop.f32.mrf.mxu0  ;;  %v1107_v12 = vadd.f32 %v1106_v53, %v1053_v61 }
 0x107   :  { %v2612_v55 = vpop.f32.mrf.mxu1 }
 0x108   :  { %v1057_v2 = vpop.f32.mrf.mxu0 }
 0x109   :  { %v1110_v56 = vpop.f32.mrf.mxu1 }
 0x10a   :  { %v2626_v3 = vpop.f32.mrf.mxu0  ;;  %v1111_v54 = vadd.f32 %v1110_v56, %v1057_v2 }
 0x10b   :  { %v2614_v57 = vpop.f32.mrf.mxu1 }
 0x10c   :  { %v1063_v5 = vpop.f32.mrf.mxu0 }
 0x10d   :  { %v1116_v58 = vpop.f32.mrf.mxu1 }
 0x10e   :  { %v2632_v7 = vpop.f32.mrf.mxu0  ;;  %v1117_v26 = vadd.f32 %v1116_v58, %v1063_v5 }
 0x10f   :  { %v2618_v60 = vpop.f32.mrf.mxu1 }
 0x110   :  { %v1067_v9 = vpop.f32.mrf.mxu0 }
 0x111   :  { %v1120_v62 = vpop.f32.mrf.mxu1 }
 0x112   :  { %v1121_v39 = vadd.f32 %v1120_v62, %v1067_v9 }
 0x123   :  { %v2620_v63 = vpop.f32.mrf.mxu1 }
 0x125   :  { %v2624_v1 = vpop.f32.mrf.mxu1 }
 0x127   :  { %v2628_v4 = vpop.f32.mrf.mxu1 }
 0x129   :  { %v2630_v6 = vpop.f32.mrf.mxu1 }
 0x12b   :  { %v2634_v8 = vpop.f32.mrf.mxu1 }
 0x12d   :  { %v2636_v10 = vpop.f32.mrf.mxu1 }
 0x12f   :  { %v2640_v16 = vpop.f32.mrf.mxu1 }
 0x131   :  { %v2647_v23 = vpop.f32.mrf.mxu1 }
 0x142   :  { %v2638_v11 = vpop.f32.mrf.mxu0 }
 0x143   :  { %v1804_v34 = vpop.f32.mrf.mxu1 }
 0x144   :  { %v1159_v14 = vpop.f32.mrf.mxu0 }
 0x145   :  { %v1160_v17 = vadd.f32 %v1159_v14, %v1107_v12  ;;  %v1805_v32 = vpop.f32.mrf.mxu1 }
 0x146   :  { %v2642_v18 = vpop.f32.mrf.mxu0 }
 0x147   :  { %v1368_v19 = vsel %vm1367_vm0, %v1160_v17, -inf  ;;  %v1334_v27 = vrot.slane %v1160_v17, 2  ;;  %v1807_v58 = vpop.f32.mrf.mxu1 }
 0x148   :  { %v1369_v20 = vrot.slane %v1368_v19, 4  ;;  %v1163_v21 = vpop.f32.mrf.mxu0 }
 0x149   :  { %v1164_v24 = vadd.f32 %v1163_v21, %v1111_v54  ;;  %v1808_v15 = vpop.f32.mrf.mxu1 }
 0x14a   :  { %v2649_v25 = vpop.f32.mrf.mxu0  ;;  %v1370_v30 = vmax.f32 %v1368_v19, %v1369_v20 }
 0x14b   :  { %v1335_v28 = vrot.slane %v1164_v24, 2  ;;  %v1375_v29 = vsel %vm1367_vm0, %v1164_v24, -inf }
 0x14c   :  { %v1376_v31 = vrot.slane %v1375_v29, 4  ;;  %v1169_v33 = vpop.f32.mrf.mxu0  ;;  %v1371_v13 = vrot.slane %v1370_v30, 2 }
 0x14d   :  { %v1170_v35 = vadd.f32 %v1169_v33, %v1117_v26  ;;  %v1341_v36 = vsel %vm1338_vm1, %v1334_v27, %v1335_v28  ;;  %v1810_v26 = vpop.f32.mrf.mxu1  ;;  %v1806_v33 = vadd.f32 %v1805_v32, %v1804_v34  ;;  %v1809_v34 = vadd.f32 %v1808_v15, %v1807_v58 }
 0x14e   :  { %v1377_v37 = vmax.f32 %v1375_v29, %v1376_v31  ;;  %v2655_v38 = vpop.f32.mrf.mxu0  ;;  %1351 = vrot.lane.b32.xlu0 %v1341_v36, %s2038_s1  ;;  %v1372_v51 = vmax.f32 %v1370_v30, %v1371_v13 }
 0x14f   :  { %v1336_v41 = vrot.slane %v1170_v35, 2  ;;  %v1382_v42 = vsel %vm1367_vm0, %v1170_v35, -inf  ;;  %v1105_v35 = vadd.f32 %v2610_v52, %v2616_v59 }
 0x150   :  { %v1378_v43 = vrot.slane %v1377_v37, 2  ;;  %v1383_v44 = vrot.slane %v1382_v42, 4  ;;  %v1173_v45 = vpop.f32.mrf.mxu0  ;;  %v1373_v9 = vrot.slane %v1372_v51, 1 }
 0x151   :  { %v1174_v46 = vadd.f32 %v1173_v45, %v1121_v39  ;;  %v1340_v40 = vsel %vm1338_vm1, %v1335_v28, %v1336_v41  ;;  %v1109_v28 = vadd.f32 %v2612_v55, %v2622_v0  ;;  %v1811_v39 = vpop.f32.mrf.mxu1  ;;  %v1115_v55 = vadd.f32 %v2614_v57, %v2626_v3 }
 0x152   :  { %v1379_v47 = vmax.f32 %v1377_v37, %v1378_v43  ;;  %v1384_v48 = vmax.f32 %v1382_v42, %v1383_v44  ;;  %1353 = vrot.lane.b32.xlu0 %v1340_v40, %s2038_s1  ;;  %v1374_v21 = vmax.f32 %v1372_v51, %v1373_v9  ;;  %v1158_v0 = vadd.f32 %v2638_v11, %v1105_v35 }
 0x153   :  { %v1337_v49 = vrot.slane %v1174_v46, 2  ;;  %v1389_v50 = vsel %vm1367_vm0, %v1174_v46, -inf  ;;  %v1162_v36 = vadd.f32 %v2642_v18, %v1109_v28  ;;  %v1168_v52 = vadd.f32 %v2649_v25, %v1115_v55  ;;  %v1813_v18 = vpop.f32.mrf.mxu1 }
 0x154   :  { %v1385_v53 = vrot.slane %v1384_v48, 2  ;;  %v1390_v56 = vrot.slane %v1389_v50, 4  ;;  %v1380_v62 = vrot.slane %v1379_v47, 1  ;;  %v1119_v43 = vadd.f32 %v2618_v60, %v2632_v7 }
 0x155   :  { %v1339_v61 = vsel %vm1338_vm1, %v1336_v41, %v1337_v49  ;;  %v1342_v17 = vsel %vm1338_vm1, %v1337_v49, %v1334_v27  ;;  %v1778_v27 = vadd.f32 %v2624_v1, %v2620_v63  ;;  %v1781_v63 = vadd.f32 %v2630_v6, %v2628_v4  ;;  %v1814_v40 = vpop.f32.mrf.mxu1 }
 0x156   :  { %v1386_v2 = vmax.f32 %v1384_v48, %v1385_v53  ;;  %v1391_v5 = vmax.f32 %v1389_v50, %v1390_v56  ;;  %1355 = vrot.lane.b32.xlu1 %v1339_v61, %s2038_s1  ;;  %v1381_v54 = vmax.f32 %v1379_v47, %v1380_v62  ;;  %v1324_v42 = vrot.slane %v1162_v36, 1 }
 0x157   :  { %v1260_v1 = vadd.f32 %v1806_v33, %v1778_v27  ;;  %v1323_v57 = vrot.slane %v1158_v0, 1  ;;  %v1784_v11 = vadd.f32 %v2636_v10, %v2634_v8  ;;  %v1263_v4 = vadd.f32 %v1809_v34, %v1781_v63  ;;  %v1520_v34 = vld [vmem:[%s2843_s3 + $0x78] sm:$0xff] }
 0x158   :  { %v1387_v12 = vrot.slane %v1386_v2, 1  ;;  %v1392_v14 = vrot.slane %v1391_v5, 2  ;;  %v1459_v30 = vsel %vm1458_vm2, %v1381_v54, %v1374_v21  ;;  %v1812_v6 = vadd.f32 %v1811_v39, %v1810_v26 }
 0x159   :  { %v1325_v45 = vrot.slane %v1168_v52, 1  ;;  %v1172_v32 = vadd.f32 %v2655_v38, %v1119_v43  ;;  %v1332_v25 = vsel %vm1329_vm5, %v1323_v57, %v1324_v42  ;;  %v1787_v7 = vadd.f32 %v2647_v23, %v2640_v16 }
 0x15a   :  { %v1393_v19 = vmax.f32 %v1391_v5, %v1392_v14  ;;  %1357 = vrot.lane.b32.xlu1 %v1342_v17, %s2038_s1  ;;  %v1388_v20 = vmax.f32 %v1386_v2, %v1387_v12  ;;  %v1268_v49 = vadd.f32 %v1812_v6, %v1784_v11  ;;  %v1815_v50 = vadd.f32 %v1814_v40, %v1813_v18  ;;  %v1518_v18 = vld [vmem:[%s2843_s3 + $0x68] sm:$0xff]  ;;  %v1512_v40 = vld [vmem:[%s2843_s3 + $0x38] sm:$0xff] }
 0x15b   :  { %v1326_v38 = vrot.slane %v1172_v32, 1  ;;  %v1331_v53 = vsel %vm1329_vm5, %v1324_v42, %v1325_v45  ;;  %v1519_v42 = vld [vmem:[%s2843_s3 + $0x70] sm:$0xff] }
 0x15c   :  { %v1394_v24 = vrot.slane %v1393_v19, 1  ;;  %v1461_v31 = vsel %vm1460_vm3, %v1388_v20, %v1459_v30  ;;  %v1271_v2 = vadd.f32 %v1815_v50, %v1787_v7  ;;  %v1515_v32 = vld [vmem:[%s2843_s3 + $0x50] sm:$0xff]  ;;  %v1510_v7 = vld [vmem:[%s2843_s3 + $0x28] sm:$0xff]  ;;  %v1505_v50 = vld [vmem:[%s2843_s3] sm:$0xff] }
 0x15d   :  { %v1330_v12 = vsel %vm1329_vm5, %v1325_v45, %v1326_v38  ;;  %v1333_v28 = vsel %vm1329_vm5, %v1326_v38, %v1323_v57  ;;  %v1528_v38 = vld [vmem:[%s2843_s3 + $0xb8] sm:$0xff] }
 0x15e   :  { %v1395_v29 = vmax.f32 %v1393_v19, %v1394_v24 }
 0x160   :  { %v1463_v37 = vsel %vm1462_vm4, %v1395_v29, %v1461_v31 }
 0x161   :  { %1464 = vrot.lane.b32.xlu0 %v1463_v37, %s2038_s1 }
 0x162   :  { %v1832_v41 = vpop.f32.mrf.mxu0 }
 0x164   :  { %v1833_v59 = vpop.f32.mrf.mxu0 }
 0x165   :  { %v1834_v13 = vadd.f32 %v1833_v59, %v1832_v41 }
 0x166   :  { %v1835_v3 = vpop.f32.mrf.mxu0 }
 0x167   :  { %v1309_v44 = vadd.f32 %v1834_v13, %v1260_v1  ;;  %v2039_v1 = vmov 0.0  }
 0x168   :  { %v1836_v46 = vpop.f32.mrf.mxu0  ;;  %1539 = vmatprep.subr.mxu1 %v2039_v1 }
 0x169   :  { %v2694_v47 = vadd.f32 %v1332_v25, %v1309_v44  ;;  %v1837_v60 = vadd.f32 %v1836_v46, %v1835_v3  ;;  %1540 = vmatpush1.msra.mxu1 %v1520_v34  ;;  %v1517_v3 = vld [vmem:[%s2843_s3 + $0x60] sm:$0xff]  ;;  %v1514_v25 = vld [vmem:[%s2843_s3 + $0x48] sm:$0xff] }
 0x16a   :  { %v1838_v48 = vpop.f32.mrf.mxu0  ;;  %1541 = vmatprep.subr.mxu1 %v2039_v1  ;;  %v1513_v46 = vld [vmem:[%s2843_s3 + $0x40] sm:$0xff] }
 0x16b   :  { %v1397_v8 = vsel %vm1396_vm6, %v2694_v47, -inf  ;;  %v1312_v10 = vadd.f32 %v1837_v60, %v1263_v4  ;;  %1542 = vmatpush1.msra.mxu1 %v1519_v42  ;;  %v1516_v4 = vld [vmem:[%s2843_s3 + $0x58] sm:$0xff]  ;;  %v1511_v60 = vld [vmem:[%s2843_s3 + $0x30] sm:$0xff] }
 0x16c   :  { %v1398_v51 = vrot.slane %v1397_v8, 4  ;;  %v1839_v56 = vpop.f32.mrf.mxu0  ;;  %1543 = vmatprep.subr.mxu1 %v2039_v1 }
 0x16d   :  { %v2702_v58 = vadd.f32 %v1331_v53, %v1312_v10  ;;  %v1840_v61 = vadd.f32 %v1839_v56, %v1838_v48  ;;  %1544 = vmatpush1.msra.mxu1 %v1518_v18  ;;  %v1509_v48 = vld [vmem:[%s2843_s3 + $0x20] sm:$0xff]  ;;  %v1507_v10 = vld [vmem:[%s2843_s3 + $0x10] sm:$0xff]  ;;  %v1526_v53 = vld [vmem:[%s2843_s3 + $0xa8] sm:$0xff] }
 0x16e   :  { %v1841_v62 = vpop.f32.mrf.mxu0  ;;  %v1399_v5 = vmax.f32 %v1397_v8, %v1398_v51  ;;  %1545 = vmatprep.subr.mxu1 %v2039_v1  ;;  %v1508_v8 = vld [vmem:[%s2843_s3 + $0x18] sm:$0xff]  ;;  %v1527_v51 = vld [vmem:[%s2843_s3 + $0xb0] sm:$0xff]  ;;  %v1525_v56 = vld [vmem:[%s2843_s3 + $0xa0] sm:$0xff] }
 0x16f   :  { %v1404_v16 = vsel %vm1396_vm6, %v2702_v58, -inf  ;;  %v1317_v23 = vadd.f32 %v1840_v61, %v1268_v49  ;;  %1546 = vmatpush1.msra.mxu1 %v1517_v3  ;;  %v1506_v49 = vld [vmem:[%s2843_s3 + $0x8] sm:$0xff]  ;;  %v1524_v61 = vld [vmem:[%s2843_s3 + $0x98] sm:$0xff] }
 0x170   :  { %v1405_v9 = vrot.slane %v1404_v16, 4  ;;  %v1842_v14 = vpop.f32.mrf.mxu0  ;;  %v1400_v21 = vrot.slane %v1399_v5, 2  ;;  %1547 = vmatprep.subr.mxu1 %v2039_v1 }
 0x171   :  { %v2708_v15 = vadd.f32 %v1330_v12, %v1317_v23  ;;  %v1843_v17 = vadd.f32 %v1842_v14, %v1841_v62  ;;  %1548 = vmatpush1.msra.mxu1 %v1516_v4  ;;  %v1497_v4 = vsub.s32 1, %v2645_v22 }
 0x172   :  { %v1406_v54 = vmax.f32 %v1404_v16, %v1405_v9  ;;  %v1401_v33 = vmax.f32 %v1399_v5, %v1400_v21  ;;  %1549 = vmatprep.subr.mxu1 %v2039_v1 }
 0x173   :  { %v1411_v19 = vsel %vm1396_vm6, %v2708_v15, -inf  ;;  %v1320_v20 = vadd.f32 %v1843_v17, %v1271_v2  ;;  %1550 = vmatpush1.msra.mxu1 %v1515_v32 }
 0x174   :  { %v1407_v24 = vrot.slane %v1406_v54, 2  ;;  %v1412_v26 = vrot.slane %v1411_v19, 4  ;;  %v1402_v0 = vrot.slane %v1401_v33, 1  ;;  %1551 = vmatprep.subr.mxu1 %v2039_v1 }
 0x175   :  { %v2714_v29 = vadd.f32 %v1333_v28, %v1320_v20  ;;  %1552 = vmatpush1.msra.mxu1 %v1514_v25 }
 0x176   :  { %v1408_v30 = vmax.f32 %v1406_v54, %v1407_v24  ;;  %v1413_v27 = vmax.f32 %v1411_v19, %v1412_v26  ;;  %v1403_v43 = vmax.f32 %v1401_v33, %v1402_v0  ;;  %1553 = vmatprep.subr.mxu1 %v2039_v1  ;;  %v1521_v0 = vld [vmem:[%s2843_s3 + $0x80] sm:$0xff] }
 0x177   :  { %v1418_v31 = vsel %vm1396_vm6, %v2714_v29, -inf  ;;  %1554 = vmatpush1.msra.mxu1 %v1513_v46 }
 0x178   :  { %v1414_v35 = vrot.slane %v1413_v27, 2  ;;  %v1419_v36 = vrot.slane %v1418_v31, 4  ;;  %v1409_v37 = vrot.slane %v1408_v30, 1  ;;  %1555 = vmatprep.subr.mxu1 %v2039_v1 }
 0x179   :  { %1556 = vmatpush1.msra.mxu1 %v1512_v40 }
 0x17a   :  { %v1415_v39 = vmax.f32 %v1413_v27, %v1414_v35  ;;  %v1420_v55 = vmax.f32 %v1418_v31, %v1419_v36  ;;  %v1410_v52 = vmax.f32 %v1408_v30, %v1409_v37  ;;  %1557 = vmatprep.subr.mxu1 %v2039_v1 }
 0x17b   :  { %1558 = vmatpush1.msra.mxu1 %v1511_v60 }
 0x17c   :  { %v1421_v41 = vrot.slane %v1420_v55, 2  ;;  %v1416_v63 = vrot.slane %v1415_v39, 1  ;;  %v1471_v44 = vsel %vm1458_vm2, %v1410_v52, %v1403_v43  ;;  %1559 = vmatprep.subr.mxu1 %v2039_v1 }
 0x17d   :  { %1560 = vmatpush1.msra.mxu1 %v1510_v7 }
 0x17e   :  { %v1422_v59 = vmax.f32 %v1420_v55, %v1421_v41  ;;  %v1417_v13 = vmax.f32 %v1415_v39, %v1416_v63  ;;  %1561 = vmatprep.subr.mxu1 %v2039_v1 }
 0x17f   :  { %1562 = vmatpush1.msra.mxu1 %v1509_v48 }
 0x180   :  { %v1423_v57 = vrot.slane %v1422_v59, 1  ;;  %v1472_v6 = vsel %vm1460_vm3, %v1417_v13, %v1471_v44  ;;  %1563 = vmatprep.subr.mxu1 %v2039_v1  ;;  %v1493_v44 = vsub.s32 0, %v2645_v22 }
 0x181   :  { %1564 = vmatpush1.msra.mxu1 %v1508_v8 }
 0x182   :  { %v1424_v11 = vmax.f32 %v1422_v59, %v1423_v57  ;;  %1565 = vmatprep.subr.mxu1 %v2039_v1 }
 0x183   :  { %1566 = vmatpush1.msra.mxu1 %v1507_v10  ;;  %v1758_v10 = vld [vmem:[%s2845_s4] ss:$0 sm:$0xff] }
 0x184   :  { %v1473_v45 = vsel %vm1462_vm4, %v1424_v11, %v1472_v6  ;;  %1567 = vmatprep.subr.mxu1 %v2039_v1 }
 0x185   :  { %1474 = vrot.lane.b32.xlu1 %v1473_v45, %s2038_s1  ;;  %1568 = vmatpush1.msra.mxu1 %v1506_v49 }
 0x186   :  { %1569 = vmatprep.subr.mxu1 %v2039_v1 }
 0x187   :  { %1570 = vmatpush1.msra.mxu1 %v1505_v50 }
 0x188   :  { %1587 = vmatprep.subr.mxu1 %v2039_v1 }
 0x189   :  { %1588 = vmatpush2.msra.mxu1 %v1528_v38 }
 0x18a   :  { %1589 = vmatprep.subr.mxu1 %v2039_v1 }
 0x18b   :  { %1590 = vmatpush2.msra.mxu1 %v1527_v51 }
 0x18c   :  { %1591 = vmatprep.subr.mxu1 %v2039_v1 }
 0x18d   :  { %1592 = vmatpush2.msra.mxu1 %v1526_v53 }
 0x18e   :  { %1593 = vmatprep.subr.mxu1 %v2039_v1 }
 0x18f   :  { %1594 = vmatpush2.msra.mxu1 %v1525_v56 }
 0x190   :  { %1595 = vmatprep.subr.mxu1 %v2039_v1 }
 0x191   :  { %1596 = vmatpush2.msra.mxu1 %v1524_v61 }
 0x192   :  { %1597 = vmatprep.subr.mxu1 %v2039_v1 }
 0x1c0   :  { %v1352_v62 = vpop.permute.xlu0 %1351 }
 0x1c1   :  { %v1363_v16 = vadd.f32 %v1352_v62, %v2694_v47 }
 0x1c3   :  { %v1426_v23 = vsel %vm1425_vm7, %v1363_v16, -inf }
 0x1c4   :  { %v1427_v2 = vrot.slane %v1426_v23, 4  ;;  %v1354_v5 = vpop.permute.xlu0 %1353 }
 0x1c5   :  { %v1364_v9 = vadd.f32 %v1354_v5, %v2702_v58 }
 0x1c6   :  { %v1428_v14 = vmax.f32 %v1426_v23, %v1427_v2 }
 0x1c7   :  { %v1433_v12 = vsel %vm1425_vm7, %v1364_v9, -inf }
 0x1c8   :  { %v1434_v17 = vrot.slane %v1433_v12, 4  ;;  %v1356_v54 = vpop.permute.xlu1 %1355  ;;  %v1429_v24 = vrot.slane %v1428_v14, 2 }
 0x1c9   :  { %v1365_v19 = vadd.f32 %v1356_v54, %v2708_v15  ;;  %v1523_v15 = vld [vmem:[%s2843_s3 + $0x90] sm:$0xff] }
 0x1ca   :  { %v1435_v20 = vmax.f32 %v1433_v12, %v1434_v17  ;;  %v1430_v33 = vmax.f32 %v1428_v14, %v1429_v24  ;;  %1598 = vmatpush2.msra.mxu1 %v1523_v15 }
 0x1cb   :  { %v1440_v21 = vsel %vm1425_vm7, %v1365_v19, -inf  ;;  %1599 = vmatprep.subr.mxu1 %v2039_v1 }
 0x1cc   :  { %v1436_v26 = vrot.slane %v1435_v20, 2  ;;  %v1441_v28 = vrot.slane %v1440_v21, 4  ;;  %v1358_v47 = vpop.permute.xlu1 %1357  ;;  %v1431_v41 = vrot.slane %v1430_v33, 1 }
 0x1cd   :  { %v1366_v30 = vadd.f32 %v1358_v47, %v2714_v29  ;;  %v1522_v29 = vld [vmem:[%s2843_s3 + $0x88] sm:$0xff] }
 0x1ce   :  { %v1437_v27 = vmax.f32 %v1435_v20, %v1436_v26  ;;  %v1442_v31 = vmax.f32 %v1440_v21, %v1441_v28  ;;  %1600 = vmatpush2.msra.mxu1 %v1522_v29  ;;  %v1432_v18 = vmax.f32 %v1430_v33, %v1431_v41 }
 0x1cf   :  { %v1447_v58 = vsel %vm1425_vm7, %v1366_v30, -inf  ;;  %1601 = vmatprep.subr.mxu1 %v2039_v1  ;;  %v1489_v1 = vld [vmem:[%s2844_s2] sm:$0x3] }
 0x1d0   :  { %v1443_v35 = vrot.slane %v1442_v31, 2  ;;  %v1448_v36 = vrot.slane %v1447_v58, 4  ;;  %v1438_v37 = vrot.slane %v1437_v27, 1  ;;  %1602 = vmatpush2.msra.mxu1 %v1521_v0  ;;  %v1494_v32 = vrot.slane %v1489_v1, %v1493_v44 }
 0x1d1   :  { %v1498_v46 = vrot.slane %v1489_v1, %v1497_v4 }
 0x1d2   :  { %v1444_v39 = vmax.f32 %v1442_v31, %v1443_v35  ;;  %v1449_v55 = vmax.f32 %v1447_v58, %v1448_v36  ;;  %v1439_v42 = vmax.f32 %v1437_v27, %v1438_v37 }
 0x1d3   :  { %v1465_v45 = vpop.permute.xlu0 %1464 }
 0x1d4   :  { %v1445_v63 = vrot.slane %v1444_v39, 1  ;;  %v1450_v34 = vrot.slane %v1449_v55, 2  ;;  %v1481_v57 = vsel %vm1458_vm2, %v1439_v42, %v1432_v18 }
 0x1d6   :  { %v1451_v52 = vmax.f32 %v1449_v55, %v1450_v34  ;;  %v1446_v59 = vmax.f32 %v1444_v39, %v1445_v63 }
 0x1d8   :  { %v1452_v13 = vrot.slane %v1451_v52, 1  ;;  %v1482_v3 = vsel %vm1460_vm3, %v1446_v59, %v1481_v57 }
 0x1da   :  { %v1453_v43 = vmax.f32 %v1451_v52, %v1452_v13 }
 0x1dc   :  { %v1483_v11 = vsel %vm1462_vm4, %v1453_v43, %v1482_v3 }
 0x1dd   :  { %1484 = vrot.lane.b32.xlu0 %v1483_v11, %s2038_s1 }
 0x1f7   :  { %v1475_v6 = vpop.permute.xlu1 %1474 }
 0x1f8   :  { %v1488_v25 = vsel %vm1487_vm8, %v1465_v45, %v1475_v6 }
 0x1f9   :  { %v1501_v40 = vadd.f32 %v1494_v32, %v1488_v25 }
 0x1fb   :  { %v1503_v8 = vmax.f32 %v1501_v40, 0.0 }
 0x24f   :  { %v1485_v60 = vpop.permute.xlu0 %1484 }
 0x250   :  { %v1502_v7 = vadd.f32 %v1498_v46, %v1485_v60 }
 0x252   :  { %v1504_v48 = vmax.f32 %v1502_v7, 0.0 }
 0x254   :  { %1759 = vmatprep.mubr.msk.f32.mxu1 %vm1487_vm8, %v1504_v48 }
 0x255   :  { %1604 = vmatmul.mubr.f32.vlgmr.msra.gmra.mxu1 %v1503_v8 }
 0x315   :  { %v1605_v49 = vpop.f32.mrf.mxu1 }
 0x316   :  { %v1606_v50 = vadd.f32 %v1758_v10, %v1605_v49 }
 0x317   :  { %v1607_v22 = vpop.f32.mrf.mxu1 }
 0x318   :  { %1609 = vst [vmem:[%s2846_s5] sm:$0xf] %v1606_v50 }

</bundles_post_ra>
